<compile_context>
chip_gen: v5e
topology: v5e:2x2
jax: 0.10.0
libtpu: 0.0.40
codegen_flags: <defaults>
</compile_context>

<pallas_src>
import functools

import jax
import jax.numpy as jnp
from jax.experimental import pallas as pl
from jax.experimental.pallas import tpu as pltpu

LANE = 128  # TPU lane width


# ----------------------------------------------------------------------------
# Per-generation tuning knobs (detected once at import time)
# ----------------------------------------------------------------------------
def _detect_tpu():
    try:
        kind = jax.devices()[0].device_kind.lower()
    except Exception:
        kind = ""
    if "v7" in kind:
        return 2, 48 << 20          # 2 TensorCores/chip, 64 MiB physical VMEM
    if "v5" in kind or "v6" in kind:
        return 1, 96 << 20          # single TC, 128 MiB physical VMEM
    return 1, 48 << 20              # unknown: conservative


_NUM_TC, _VMEM_CAP = _detect_tpu()
_VMEM_BUDGET = int(_VMEM_CAP * 0.8)


def _round_up(v, m=LANE):
    return ((v + m - 1) // m) * m


# ----------------------------------------------------------------------------
# Pallas kernels: tiled (M, K) @ (K, N) + bias, optionally fused SiLU.
# ----------------------------------------------------------------------------
def _mm_bias_act_single_kernel(a_ref, w_ref, b_ref, o_ref, *, silu):
    """Single K step: no accumulator scratch, no pl.when branches."""
    acc = jnp.dot(a_ref[...], w_ref[...], preferred_element_type=jnp.float32)
    acc = acc + b_ref[...].astype(jnp.float32)
    if silu:
        # SiLU = x * sigmoid(x), fp32 (sigmoid on the EUP path)
        acc = acc * jax.nn.sigmoid(acc)
    o_ref[...] = acc.astype(o_ref.dtype)


def _mm_bias_act_multi_kernel(a_ref, w_ref, b_ref, o_ref, acc_ref, *, silu):
    """Grid = (M tiles [parallel], K tiles [arbitrary reduction])."""
    k = pl.program_id(1)

    @pl.when(k == 0)
    def _():
        acc_ref[...] = jnp.zeros_like(acc_ref)

    acc_ref[...] += jnp.dot(a_ref[...], w_ref[...],
                            preferred_element_type=jnp.float32)

    @pl.when(k == pl.num_programs(1) - 1)
    def _():
        acc = acc_ref[...] + b_ref[...].astype(jnp.float32)
        if silu:
            acc = acc * jax.nn.sigmoid(acc)
        o_ref[...] = acc.astype(o_ref.dtype)


def _tile_footprint(tm, Np, tk, out_bytes, multi_k):
    acc = tm * Np * 4 if multi_k else 0
    a_buf = 2 * tm * tk * 2           # bf16, double buffered
    w_buf = 2 * tk * Np * 2           # bf16, double buffered
    o_buf = 2 * tm * Np * out_bytes
    bias = 2 * Np * 4
    return acc + a_buf + w_buf + o_buf + bias


def _select_tm(Mp, Np, tk, out_bytes, multi_k):
    """Largest M tile that fits the VMEM budget.

    v7x (2 TCs): prefer exactly two M tiles so both TensorCores get work.
    v5e / v6e (1 TC): prefer a single M tile (fewest grid steps)."""
    cands = []
    t = Mp
    while t >= 8:
        if t % 8 == 0 and Mp % t == 0:
            cands.append(t)
        t //= 2
    if not cands:
        cands = [Mp]
    if _NUM_TC >= 2 and len(cands) > 1:
        cands = cands[1:] + cands[:1]     # Mp/2, Mp/4, ..., Mp last
    for tm in cands:
        if _tile_footprint(tm, Np, tk, out_bytes, multi_k) <= _VMEM_BUDGET:
            return tm
    return cands[-1]


def matmul_bias_act(a, w_p, b_p, k_orig, n_orig, *, silu,
                    out_dtype=jnp.bfloat16):
    """a: (M, k_orig); w_p: (Kp, Np) pre-padded bf16; b_p: (1, Np) fp32.

    Returns (M, n_orig) with fused bias (+ SiLU).  Weight/bias padding and
    casting were hoisted to init time; only the activation side is padded
    here (fuses with the im2col glue under jit)."""
    M, K = a.shape
    Kp, Np = w_p.shape
    assert K == k_orig and Kp % LANE == 0 and Np % LANE == 0

    a = a.astype(jnp.bfloat16)
    if Kp != K:
        a = jnp.pad(a, ((0, 0), (0, Kp - K)))

    # Sublane alignment for M; on v7x also make Mp divisible by 16 so the
    # two-tile split keeps each tile a multiple of 8 rows.
    m_align = 16 if _NUM_TC >= 2 else 8
    pad_m = (-M) % m_align
    if pad_m:
        a = jnp.pad(a, ((0, pad_m), (0, 0)))
    Mp = M + pad_m

    # K tile (Kp is a multiple of 128, so one of these always divides).
    tk = LANE
    for cand in (512, 256, 128):
        if Kp % cand == 0:
            tk = cand
            break
    k_steps = Kp // tk
    multi_k = k_steps > 1

    out_bytes = 2 if out_dtype in (jnp.bfloat16, jnp.float16) else 4
    tm = _select_tm(Mp, Np, tk, out_bytes, multi_k)

    vmem_need = _tile_footprint(tm, Np, tk, out_bytes, multi_k)
    vmem_limit = int(min(max(2 * vmem_need, 16 << 20), _VMEM_CAP))

    if not multi_k:
        # Fast path: whole contraction in one tile -> no accumulator scratch.
        out = pl.pallas_call(
            functools.partial(_mm_bias_act_single_kernel, silu=silu),
            out_shape=jax.ShapeDtypeStruct((Mp, Np), out_dtype),
            grid_spec=pltpu.PrefetchScalarGridSpec(
                num_scalar_prefetch=0,
                grid=(Mp // tm,),
                in_specs=[
                    pl.BlockSpec((tm, Kp), lambda i: (i, 0)),   # A row tile
                    pl.BlockSpec((Kp, Np), lambda i: (0, 0)),   # full weight
                    pl.BlockSpec((1, Np), lambda i: (0, 0)),    # bias row
                ],
                out_specs=pl.BlockSpec((tm, Np), lambda i: (i, 0)),
            ),
            compiler_params=pltpu.CompilerParams(
                dimension_semantics=("parallel",),
                vmem_limit_bytes=vmem_limit),
        )(a, w_p, b_p)
    else:
        out = pl.pallas_call(
            functools.partial(_mm_bias_act_multi_kernel, silu=silu),
            out_shape=jax.ShapeDtypeStruct((Mp, Np), out_dtype),
            grid_spec=pltpu.PrefetchScalarGridSpec(
                num_scalar_prefetch=0,
                grid=(Mp // tm, k_steps),
                in_specs=[
                    pl.BlockSpec((tm, tk), lambda i, k: (i, k)),   # A tile
                    pl.BlockSpec((tk, Np), lambda i, k: (k, 0)),   # W K tile
                    pl.BlockSpec((1, Np), lambda i, k: (0, 0)),    # bias row
                ],
                out_specs=pl.BlockSpec((tm, Np), lambda i, k: (i, 0)),
                scratch_shapes=[pltpu.VMEM((tm, Np), jnp.float32)],
            ),
            compiler_params=pltpu.CompilerParams(
                dimension_semantics=("parallel", "arbitrary"),
                vmem_limit_bytes=vmem_limit),
        )(a, w_p, b_p)
    return out[:M, :n_orig]


# ----------------------------------------------------------------------------
# Conv2d (NHWC) = im2col (XLA glue, fused under jit) + Pallas matmul
# ----------------------------------------------------------------------------
def conv2d(x, w_p, b_p, k_orig, cout, *, kh, kw, stride, padding, silu,
           out_dtype=jnp.bfloat16):
    """x: (B, H, W, Cin) NHWC; w_p/b_p pre-padded at init time."""
    B, H, W, Cin = x.shape
    x = x.astype(jnp.bfloat16)
    if padding:
        x = jnp.pad(x, ((0, 0), (padding, padding), (padding, padding), (0, 0)))
    Hp, Wp_ = x.shape[1], x.shape[2]
    Ho = (Hp - kh) // stride + 1
    Wo = (Wp_ - kw) // stride + 1
    if kh == 1 and kw == 1 and stride == 1:
        a = x.reshape(B * Ho * Wo, Cin)
    else:
        # TODO(synk): fully in-kernel patch extraction (K grid over taps /
        # space-to-depth for stride 2) would avoid materializing the
        # kh*kw-fold im2col matrix in HBM; kept as XLA glue (fused under jit).
        patches = []
        for ky in range(kh):
            for kx in range(kw):
                sl = x[:, ky:ky + stride * (Ho - 1) + 1:stride,
                          kx:kx + stride * (Wo - 1) + 1:stride, :]
                patches.append(sl)
        # channel order (ky, kx, cin) matches w.reshape(kh*kw*Cin, Cout)
        a = jnp.concatenate(patches, axis=-1).reshape(B * Ho * Wo, kh * kw * Cin)
    out = matmul_bias_act(a, w_p, b_p, k_orig, cout, silu=silu,
                          out_dtype=out_dtype)
    return out.reshape(B, Ho, Wo, cout)


# ----------------------------------------------------------------------------
# Synthetic YOLO-style config (replaces the yaml file) + parse logic
# ----------------------------------------------------------------------------
# each layer: [from, repeats, module, args]
CFG = {
    "backbone": [
        [-1, 1, "Conv", [8, 3, 2]],      # 0: 4->8,  3x3 s2
        [-1, 1, "Conv", [16, 3, 2]],     # 1: 8->16, 3x3 s2
        [-1, 1, "Conv", [16, 3, 1]],     # 2: 16->16, 3x3 s1
    ],
    "head": [
        [[-1, 1], 1, "Concat", [1]],     # 3: concat(layer2, layer1) -> 32ch
        [-1, 1, "Conv", [16, 1, 1]],     # 4: 32->16, 1x1
        [[2, 4], 1, "Detect", [2]],      # 5: detect head over layers 2 and 4
    ],
}
NUM_CLASSES = 2
DETECT_NO = NUM_CLASSES + 4  # box(4) + classes


def parse_cfg(cfg):
    """Mirrors YOLOFeatureExtractor._parse_yaml."""
    concat_map, detect_map = {}, {}
    all_layers = cfg["backbone"] + cfg["head"]
    for idx, layer in enumerate(all_layers):
        if "Concat" in layer[2]:
            concat_map[idx] = layer[0]
        if "Detect" in layer[2]:
            detect_map[idx] = layer[0]
    return concat_map, detect_map


def _prep_matmul_weights(w2d, bias):
    """w2d: (K, N) fp32, bias: (N,) -> (Kp, Np) bf16 weight, (1, Np) fp32 bias."""
    K, N = w2d.shape
    Kp, Np = _round_up(K), _round_up(N)
    w_p = jnp.pad(w2d.astype(jnp.bfloat16), ((0, Kp - K), (0, Np - N)))
    b_p = jnp.pad(bias.astype(jnp.float32).reshape(1, N), ((0, 0), (0, Np - N)))
    return w_p, b_p, K, N


def init_params(cfg, in_ch):
    """Deterministic weight init; all static weight prep (reshape, bf16 cast,
    lane padding) is done HERE, once, not per forward call."""
    key = jax.random.PRNGKey(0)
    all_layers = cfg["backbone"] + cfg["head"]
    params, meta, channels = {}, {}, {}
    c_prev = in_ch
    for idx, layer in enumerate(all_layers):
        frm, _, mtype, args = layer
        if mtype == "Conv":
            cout, k, s = args
            cin = channels[frm] if isinstance(frm, int) and frm != -1 else c_prev
            kw_key = jax.random.fold_in(key, idx)
            w = jax.random.normal(kw_key, (k, k, cin, cout), jnp.float32) * 0.1
            b = jax.random.normal(jax.random.fold_in(kw_key, 1), (cout,),
                                  jnp.float32) * 0.01
            w_p, b_p, k_orig, n_orig = _prep_matmul_weights(
                w.reshape(k * k * cin, cout), b)
            params[idx] = (w_p, b_p)
            meta[idx] = dict(k_orig=k_orig, cout=n_orig, kh=k, kw=k,
                             stride=s, padding=k // 2)
            channels[idx] = cout
            c_prev = cout
        elif mtype == "Concat":
            cin_total = sum(c_prev if i == -1 else channels[i] for i in frm)
            channels[idx] = cin_total
            c_prev = cin_total
        elif mtype == "Detect":
            heads_raw = []
            for j, i in enumerate(frm):
                cin = channels[i]
                hkey = jax.random.fold_in(key, 1000 + 10 * idx + j)
                w = jax.random.normal(hkey, (1, 1, cin, DETECT_NO),
                                      jnp.float32) * 0.1
                b = jax.random.normal(jax.random.fold_in(hkey, 1),
                                      (DETECT_NO,), jnp.float32) * 0.01
                heads_raw.append((w, b))
            cins = [w.shape[2] for w, _ in heads_raw]
            heads_p, heads_meta = [], []
            for w, b in heads_raw:
                cin = w.shape[2]
                wp, bp, km, nm = _prep_matmul_weights(
                    w.reshape(cin, DETECT_NO), b)
                heads_p.append((wp, bp))
                heads_meta.append((km, nm))
            same = len(set(cins)) == 1
            pidx = {"heads": heads_p}
            midx = {"same_cin": same, "heads": heads_meta, "no": DETECT_NO,
                    "fused": None}
            if same:
                cin = cins[0]
                w_cat = jnp.concatenate(
                    [w.reshape(cin, DETECT_NO) for w, _ in heads_raw], axis=-1)
                b_cat = jnp.concatenate([b for _, b in heads_raw])
                w_p, b_p, km, nm = _prep_matmul_weights(w_cat, b_cat)
                pidx["fused"] = (w_p, b_p)
                midx["fused"] = (km, nm)
            params[idx] = pidx
            meta[idx] = midx
            channels[idx] = DETECT_NO
            c_prev = DETECT_NO
    return params, meta


# ----------------------------------------------------------------------------
# Forward pass mirroring YOLOFeatureExtractor.forward (fully jitted)
# ----------------------------------------------------------------------------
class YOLOFeatureExtractorPallas:
    def __init__(self, cfg, in_ch, layers_to_extract):
        self.all_layers = cfg["backbone"] + cfg["head"]
        self.layers_to_extract = list(layers_to_extract)
        self.concat_map, self.detect_map = parse_cfg(cfg)
        self.params, self.meta = init_params(cfg, in_ch)
        self.extracted_features = {}
        # jit the whole pass: pad / im2col / reshape / slice glue fuses with
        # the pallas_calls; extracted features are returned from the traced
        # function (not mutated as an attribute of traced values).
        self._forward_jit = jax.jit(self._forward_impl)

    def _detect(self, idx, params, detect_inputs):
        """Detect head: per-scale 1x1 conv, flatten, concat anchors, (B,no,A)."""
        meta = self.meta[idx]
        no = meta["no"]
        if meta["same_cin"]:
            # Fused: one pallas_call for all heads.  Inputs concatenated along
            # M, per-head weights stacked along N; pick each head's block back.
            w_p, b_p = params["fused"]
            k_orig, n_orig = meta["fused"]
            flat, m_sizes, shapes = [], [], []
            for t in detect_inputs:
                b_, h_, w_, c_ = t.shape
                flat.append(t.reshape(b_ * h_ * w_, c_))
                m_sizes.append(b_ * h_ * w_)
                shapes.append((b_, h_, w_))
            a = jnp.concatenate(flat, axis=0)
            fused = matmul_bias_act(a, w_p, b_p, k_orig, n_orig,
                                    silu=False, out_dtype=jnp.float32)
            heads, row = [], 0
            for j, (b_, h_, w_) in enumerate(shapes):
                m = m_sizes[j]
                y = fused[row:row + m, j * no:(j + 1) * no]
                heads.append(y.reshape(b_, h_ * w_, no))
                row += m
        else:
            heads = []
            for j, t in enumerate(detect_inputs):
                w_p, b_p = params["heads"][j]
                k_orig, n_orig = meta["heads"][j]
                y = conv2d(t, w_p, b_p, k_orig, n_orig, kh=1, kw=1, stride=1,
                           padding=0, silu=False, out_dtype=jnp.float32)
                b_, h_, w_, c_ = y.shape
                heads.append(y.reshape(b_, h_ * w_, c_))
        # (B, no, total_anchors) like a YOLO detect export head
        return jnp.transpose(jnp.concatenate(heads, axis=1), (0, 2, 1))

    def _forward_impl(self, params, x):
        outputs = {}
        feats = {}
        for idx, layer in enumerate(self.all_layers):
            frm, _, mtype, args = layer
            if idx in self.concat_map:
                concat_inputs = [x if i == -1 else outputs[i]
                                 for i in self.concat_map[idx]]
                # channel concat (NHWC -> last axis); pure layout glue
                x = jnp.concatenate(concat_inputs, axis=-1)
            elif idx in self.detect_map:
                detect_inputs = [outputs[i] for i in self.detect_map[idx]]
                x = self._detect(idx, params[idx], detect_inputs)
            else:
                w_p, b_p = params[idx]
                m = self.meta[idx]
                # intermediate activations emitted in bf16 (next layer is bf16)
                x = conv2d(x, w_p, b_p, m["k_orig"], m["cout"],
                           kh=m["kh"], kw=m["kw"], stride=m["stride"],
                           padding=m["padding"], silu=True,
                           out_dtype=jnp.bfloat16)
            outputs[idx] = x
            if idx in self.layers_to_extract:
                feats[f"layer_{idx}"] = x
        return x, feats

    def forward(self, x):
        """x: NHWC activations. Returns (final_output, extracted_features)."""
        out, feats = self._forward_jit(self.params, x)
        self.extracted_features = feats
        return out, feats


# TODO(synk): yaml parsing of the real ultralytics config and real checkpoint
# weights have no in-script equivalent; replaced by the synthetic CFG above.

if __name__ == "__main__":
    key = jax.random.PRNGKey(0)
    # Module expects NCHW input (like torch); small shapes: B=2, C=4, H=W=16.
    x_nchw = jax.random.normal(key, (2, 4, 16, 16), dtype=jnp.float32)
    x_nhwc = jnp.transpose(x_nchw, (0, 2, 3, 1))  # NCHW -> NHWC for the kernels

    model = YOLOFeatureExtractorPallas(CFG, in_ch=4, layers_to_extract=[0, 2, 4])
    out, feats = model.forward(x_nhwc)

    jax.block_until_ready(out)
    for v in feats.values():
        jax.block_until_ready(v)

    # Detect scales: layer 2 (4x4) and layer 4 (4x4) -> 16 + 16 anchors.
    n_anchors = 4 * 4 + 4 * 4
    assert out.shape == (2, DETECT_NO, n_anchors), out.shape
    assert set(feats.keys()) == {"layer_0", "layer_2", "layer_4"}
    assert feats["layer_0"].shape == (2, 8, 8, 8)
    assert feats["layer_2"].shape == (2, 4, 4, 16)
    assert feats["layer_4"].shape == (2, 4, 4, 16)
    assert bool(jnp.isfinite(out).all())
    print("KERNEL_OK")
</pallas_src>

<mosaic_0001>
module attributes {stable_mosaic.version = 11 : i64} {
  func.func @_mm_bias_act_single_kernel(%arg0: i32, %arg1: memref<128x128xbf16, #tpu.memory_space<vmem>>, %arg2: memref<128x128xbf16, #tpu.memory_space<vmem>>, %arg3: memref<1x128xf32, #tpu.memory_space<vmem>>, %arg4: memref<128x128xbf16, #tpu.memory_space<vmem>>) attributes {dimension_semantics = [#tpu.dimension_semantics<parallel>], iteration_bounds = array<i64: 1>, scalar_prefetch = 0 : i64, scratch_operands = 0 : i64, tpu.core_type = #tpu.core_type<tc>, window_params = [{transform_indices = @transform_0, window_bounds = array<i64: 128, 128>}, {pipeline_mode = #tpu.pipeline_mode<synchronous>, transform_indices = @transform_1, window_bounds = array<i64: 128, 128>}, {pipeline_mode = #tpu.pipeline_mode<synchronous>, transform_indices = @transform_2, window_bounds = array<i64: 1, 128>}, {transform_indices = @transform_3, window_bounds = array<i64: 128, 128>}]} {
    %c0 = arith.constant 0 : index
    %c0_0 = arith.constant 0 : index
    %0 = vector.load %arg1[%c0, %c0_0] : memref<128x128xbf16, #tpu.memory_space<vmem>>, vector<128x128xbf16>
    %c0_1 = arith.constant 0 : index
    %c0_2 = arith.constant 0 : index
    %1 = vector.load %arg2[%c0_1, %c0_2] : memref<128x128xbf16, #tpu.memory_space<vmem>>, vector<128x128xbf16>
    %cst = arith.constant dense<0.000000e+00> : vector<128x128xf32>
    %2 = tpu.matmul %0, %1, %cst {dimension_numbers = #tpu.dot_dimension_numbers<[1], [0], [0], [1], [0, 0, 1, 1], [], []>} : vector<128x128xbf16>, vector<128x128xbf16>, vector<128x128xf32> -> vector<128x128xf32>
    %c0_3 = arith.constant 0 : index
    %c0_4 = arith.constant 0 : index
    %3 = vector.load %arg3[%c0_3, %c0_4] : memref<1x128xf32, #tpu.memory_space<vmem>>, vector<1x128xf32>
    %4 = vector.broadcast %3 : vector<1x128xf32> to vector<128x128xf32>
    %5 = arith.addf %2, %4 : vector<128x128xf32>
    %6 = arith.negf %5 : vector<128x128xf32>
    %7 = math.exp %6 : vector<128x128xf32>
    %cst_5 = arith.constant 1.000000e+00 : f32
    %8 = vector.broadcast %cst_5 : f32 to vector<128x128xf32>
    %9 = arith.addf %8, %7 : vector<128x128xf32>
    %10 = arith.divf %8, %9 : vector<128x128xf32>
    %11 = arith.mulf %5, %10 : vector<128x128xf32>
    %12 = arith.truncf %11 : vector<128x128xf32> to vector<128x128xbf16>
    %c0_6 = arith.constant 0 : index
    %c0_7 = arith.constant 0 : index
    %13 = vector.load %arg4[%c0_6, %c0_7] : memref<128x128xbf16, #tpu.memory_space<vmem>>, vector<128x128xbf16>
    tpu.vector_store %arg4[%c0_6, %c0_7], %12 {strides = array<i32>} : memref<128x128xbf16, #tpu.memory_space<vmem>>, vector<128x128xbf16>,
    return
  }
  func.func @transform_0(%arg0: i32) -> (i32, i32) {
    %c0_i32 = arith.constant 0 : i32
    %c0_i32_0 = arith.constant 0 : i32
    return %arg0, %c0_i32 : i32, i32
  }
  func.func @transform_1(%arg0: i32) -> (i32, i32) {
    %c0_i32 = arith.constant 0 : i32
    %c0_i32_0 = arith.constant 0 : i32
    %c0_i32_1 = arith.constant 0 : i32
    return %c0_i32, %c0_i32_0 : i32, i32
  }
  func.func @transform_2(%arg0: i32) -> (i32, i32) {
    %c0_i32 = arith.constant 0 : i32
    %c0_i32_0 = arith.constant 0 : i32
    %c0_i32_1 = arith.constant 0 : i32
    return %c0_i32, %c0_i32_0 : i32, i32
  }
  func.func @transform_3(%arg0: i32) -> (i32, i32) {
    %c0_i32 = arith.constant 0 : i32
    %c0_i32_0 = arith.constant 0 : i32
    return %arg0, %c0_i32 : i32, i32
  }
}

module attributes {stable_mosaic.version = 11 : i64} {
  func.func @_mm_bias_act_single_kernel(%arg0: i32, %arg1: memref<32x128xbf16, #tpu.memory_space<vmem>>, %arg2: memref<128x128xbf16, #tpu.memory_space<vmem>>, %arg3: memref<1x128xf32, #tpu.memory_space<vmem>>, %arg4: memref<32x128xbf16, #tpu.memory_space<vmem>>) attributes {dimension_semantics = [#tpu.dimension_semantics<parallel>], iteration_bounds = array<i64: 1>, scalar_prefetch = 0 : i64, scratch_operands = 0 : i64, tpu.core_type = #tpu.core_type<tc>, window_params = [{transform_indices = @transform_0, window_bounds = array<i64: 32, 128>}, {pipeline_mode = #tpu.pipeline_mode<synchronous>, transform_indices = @transform_1, window_bounds = array<i64: 128, 128>}, {pipeline_mode = #tpu.pipeline_mode<synchronous>, transform_indices = @transform_2, window_bounds = array<i64: 1, 128>}, {transform_indices = @transform_3, window_bounds = array<i64: 32, 128>}]} {
    %c0 = arith.constant 0 : index
    %c0_0 = arith.constant 0 : index
    %0 = vector.load %arg1[%c0, %c0_0] : memref<32x128xbf16, #tpu.memory_space<vmem>>, vector<32x128xbf16>
    %c0_1 = arith.constant 0 : index
    %c0_2 = arith.constant 0 : index
    %1 = vector.load %arg2[%c0_1, %c0_2] : memref<128x128xbf16, #tpu.memory_space<vmem>>, vector<128x128xbf16>
    %cst = arith.constant dense<0.000000e+00> : vector<32x128xf32>
    %2 = tpu.matmul %0, %1, %cst {dimension_numbers = #tpu.dot_dimension_numbers<[1], [0], [0], [1], [0, 0, 1, 1], [], []>} : vector<32x128xbf16>, vector<128x128xbf16>, vector<32x128xf32> -> vector<32x128xf32>
    %c0_3 = arith.constant 0 : index
    %c0_4 = arith.constant 0 : index
    %3 = vector.load %arg3[%c0_3, %c0_4] : memref<1x128xf32, #tpu.memory_space<vmem>>, vector<1x128xf32>
    %4 = vector.broadcast %3 : vector<1x128xf32> to vector<32x128xf32>
    %5 = arith.addf %2, %4 : vector<32x128xf32>
    %6 = arith.negf %5 : vector<32x128xf32>
    %7 = math.exp %6 : vector<32x128xf32>
    %cst_5 = arith.constant 1.000000e+00 : f32
    %8 = vector.broadcast %cst_5 : f32 to vector<32x128xf32>
    %9 = arith.addf %8, %7 : vector<32x128xf32>
    %10 = arith.divf %8, %9 : vector<32x128xf32>
    %11 = arith.mulf %5, %10 : vector<32x128xf32>
    %12 = arith.truncf %11 : vector<32x128xf32> to vector<32x128xbf16>
    %c0_6 = arith.constant 0 : index
    %c0_7 = arith.constant 0 : index
    %13 = vector.load %arg4[%c0_6, %c0_7] : memref<32x128xbf16, #tpu.memory_space<vmem>>, vector<32x128xbf16>
    tpu.vector_store %arg4[%c0_6, %c0_7], %12 {strides = array<i32>} : memref<32x128xbf16, #tpu.memory_space<vmem>>, vector<32x128xbf16>,
    return
  }
  func.func @transform_0(%arg0: i32) -> (i32, i32) {
    %c0_i32 = arith.constant 0 : i32
    %c0_i32_0 = arith.constant 0 : i32
    return %arg0, %c0_i32 : i32, i32
  }
  func.func @transform_1(%arg0: i32) -> (i32, i32) {
    %c0_i32 = arith.constant 0 : i32
    %c0_i32_0 = arith.constant 0 : i32
    %c0_i32_1 = arith.constant 0 : i32
    return %c0_i32, %c0_i32_0 : i32, i32
  }
  func.func @transform_2(%arg0: i32) -> (i32, i32) {
    %c0_i32 = arith.constant 0 : i32
    %c0_i32_0 = arith.constant 0 : i32
    %c0_i32_1 = arith.constant 0 : i32
    return %c0_i32, %c0_i32_0 : i32, i32
  }
  func.func @transform_3(%arg0: i32) -> (i32, i32) {
    %c0_i32 = arith.constant 0 : i32
    %c0_i32_0 = arith.constant 0 : i32
    return %arg0, %c0_i32 : i32, i32
  }
}

module attributes {stable_mosaic.version = 11 : i64} {
  func.func @_mm_bias_act_single_kernel(%arg0: i32, %arg1: memref<32x256xbf16, #tpu.memory_space<vmem>>, %arg2: memref<256x128xbf16, #tpu.memory_space<vmem>>, %arg3: memref<1x128xf32, #tpu.memory_space<vmem>>, %arg4: memref<32x128xbf16, #tpu.memory_space<vmem>>) attributes {dimension_semantics = [#tpu.dimension_semantics<parallel>], iteration_bounds = array<i64: 1>, scalar_prefetch = 0 : i64, scratch_operands = 0 : i64, tpu.core_type = #tpu.core_type<tc>, window_params = [{transform_indices = @transform_0, window_bounds = array<i64: 32, 256>}, {pipeline_mode = #tpu.pipeline_mode<synchronous>, transform_indices = @transform_1, window_bounds = array<i64: 256, 128>}, {pipeline_mode = #tpu.pipeline_mode<synchronous>, transform_indices = @transform_2, window_bounds = array<i64: 1, 128>}, {transform_indices = @transform_3, window_bounds = array<i64: 32, 128>}]} {
    %c0 = arith.constant 0 : index
    %c0_0 = arith.constant 0 : index
    %0 = vector.load %arg1[%c0, %c0_0] : memref<32x256xbf16, #tpu.memory_space<vmem>>, vector<32x256xbf16>
    %c0_1 = arith.constant 0 : index
    %c0_2 = arith.constant 0 : index
    %1 = vector.load %arg2[%c0_1, %c0_2] : memref<256x128xbf16, #tpu.memory_space<vmem>>, vector<256x128xbf16>
    %cst = arith.constant dense<0.000000e+00> : vector<32x128xf32>
    %2 = tpu.matmul %0, %1, %cst {dimension_numbers = #tpu.dot_dimension_numbers<[1], [0], [0], [1], [0, 0, 1, 1], [], []>} : vector<32x256xbf16>, vector<256x128xbf16>, vector<32x128xf32> -> vector<32x128xf32>
    %c0_3 = arith.constant 0 : index
    %c0_4 = arith.constant 0 : index
    %3 = vector.load %arg3[%c0_3, %c0_4] : memref<1x128xf32, #tpu.memory_space<vmem>>, vector<1x128xf32>
    %4 = vector.broadcast %3 : vector<1x128xf32> to vector<32x128xf32>
    %5 = arith.addf %2, %4 : vector<32x128xf32>
    %6 = arith.negf %5 : vector<32x128xf32>
    %7 = math.exp %6 : vector<32x128xf32>
    %cst_5 = arith.constant 1.000000e+00 : f32
    %8 = vector.broadcast %cst_5 : f32 to vector<32x128xf32>
    %9 = arith.addf %8, %7 : vector<32x128xf32>
    %10 = arith.divf %8, %9 : vector<32x128xf32>
    %11 = arith.mulf %5, %10 : vector<32x128xf32>
    %12 = arith.truncf %11 : vector<32x128xf32> to vector<32x128xbf16>
    %c0_6 = arith.constant 0 : index
    %c0_7 = arith.constant 0 : index
    %13 = vector.load %arg4[%c0_6, %c0_7] : memref<32x128xbf16, #tpu.memory_space<vmem>>, vector<32x128xbf16>
    tpu.vector_store %arg4[%c0_6, %c0_7], %12 {strides = array<i32>} : memref<32x128xbf16, #tpu.memory_space<vmem>>, vector<32x128xbf16>,
    return
  }
  func.func @transform_0(%arg0: i32) -> (i32, i32) {
    %c0_i32 = arith.constant 0 : i32
    %c0_i32_0 = arith.constant 0 : i32
    return %arg0, %c0_i32 : i32, i32
  }
  func.func @transform_1(%arg0: i32) -> (i32, i32) {
    %c0_i32 = arith.constant 0 : i32
    %c0_i32_0 = arith.constant 0 : i32
    %c0_i32_1 = arith.constant 0 : i32
    return %c0_i32, %c0_i32_0 : i32, i32
  }
  func.func @transform_2(%arg0: i32) -> (i32, i32) {
    %c0_i32 = arith.constant 0 : i32
    %c0_i32_0 = arith.constant 0 : i32
    %c0_i32_1 = arith.constant 0 : i32
    return %c0_i32, %c0_i32_0 : i32, i32
  }
  func.func @transform_3(%arg0: i32) -> (i32, i32) {
    %c0_i32 = arith.constant 0 : i32
    %c0_i32_0 = arith.constant 0 : i32
    return %arg0, %c0_i32 : i32, i32
  }
}

module attributes {stable_mosaic.version = 11 : i64} {
  func.func @_mm_bias_act_single_kernel(%arg0: i32, %arg1: memref<64x128xbf16, #tpu.memory_space<vmem>>, %arg2: memref<128x128xbf16, #tpu.memory_space<vmem>>, %arg3: memref<1x128xf32, #tpu.memory_space<vmem>>, %arg4: memref<64x128xf32, #tpu.memory_space<vmem>>) attributes {dimension_semantics = [#tpu.dimension_semantics<parallel>], iteration_bounds = array<i64: 1>, scalar_prefetch = 0 : i64, scratch_operands = 0 : i64, tpu.core_type = #tpu.core_type<tc>, window_params = [{transform_indices = @transform_0, window_bounds = array<i64: 64, 128>}, {pipeline_mode = #tpu.pipeline_mode<synchronous>, transform_indices = @transform_1, window_bounds = array<i64: 128, 128>}, {pipeline_mode = #tpu.pipeline_mode<synchronous>, transform_indices = @transform_2, window_bounds = array<i64: 1, 128>}, {transform_indices = @transform_3, window_bounds = array<i64: 64, 128>}]} {
    %c0 = arith.constant 0 : index
    %c0_0 = arith.constant 0 : index
    %0 = vector.load %arg1[%c0, %c0_0] : memref<64x128xbf16, #tpu.memory_space<vmem>>, vector<64x128xbf16>
    %c0_1 = arith.constant 0 : index
    %c0_2 = arith.constant 0 : index
    %1 = vector.load %arg2[%c0_1, %c0_2] : memref<128x128xbf16, #tpu.memory_space<vmem>>, vector<128x128xbf16>
    %cst = arith.constant dense<0.000000e+00> : vector<64x128xf32>
    %2 = tpu.matmul %0, %1, %cst {dimension_numbers = #tpu.dot_dimension_numbers<[1], [0], [0], [1], [0, 0, 1, 1], [], []>} : vector<64x128xbf16>, vector<128x128xbf16>, vector<64x128xf32> -> vector<64x128xf32>
    %c0_3 = arith.constant 0 : index
    %c0_4 = arith.constant 0 : index
    %3 = vector.load %arg3[%c0_3, %c0_4] : memref<1x128xf32, #tpu.memory_space<vmem>>, vector<1x128xf32>
    %4 = vector.broadcast %3 : vector<1x128xf32> to vector<64x128xf32>
    %5 = arith.addf %2, %4 : vector<64x128xf32>
    %c0_5 = arith.constant 0 : index
    %c0_6 = arith.constant 0 : index
    %6 = vector.load %arg4[%c0_5, %c0_6] : memref<64x128xf32, #tpu.memory_space<vmem>>, vector<64x128xf32>
    tpu.vector_store %arg4[%c0_5, %c0_6], %5 {strides = array<i32>} : memref<64x128xf32, #tpu.memory_space<vmem>>, vector<64x128xf32>,
    return
  }
  func.func @transform_0(%arg0: i32) -> (i32, i32) {
    %c0_i32 = arith.constant 0 : i32
    %c0_i32_0 = arith.constant 0 : i32
    return %arg0, %c0_i32 : i32, i32
  }
  func.func @transform_1(%arg0: i32) -> (i32, i32) {
    %c0_i32 = arith.constant 0 : i32
    %c0_i32_0 = arith.constant 0 : i32
    %c0_i32_1 = arith.constant 0 : i32
    return %c0_i32, %c0_i32_0 : i32, i32
  }
  func.func @transform_2(%arg0: i32) -> (i32, i32) {
    %c0_i32 = arith.constant 0 : i32
    %c0_i32_0 = arith.constant 0 : i32
    %c0_i32_1 = arith.constant 0 : i32
    return %c0_i32, %c0_i32_0 : i32, i32
  }
  func.func @transform_3(%arg0: i32) -> (i32, i32) {
    %c0_i32 = arith.constant 0 : i32
    %c0_i32_0 = arith.constant 0 : i32
    return %arg0, %c0_i32 : i32, i32
  }
}

</mosaic_0001>

<bundles_post_ra>
// kernel: _forward_impl.5
= control target key start
LH: loop header
LB: loop body
LE: loop exit
PB: predicated region body
PF: predicated region fallthrough
CT: control target
= control target key end

     0   :  { %s1289_s1 = inlined_call_operand.vmem [shape: bf16[128,128], index: 1, kind: input, shape index: {}]   ;;  %s1290_s2 = inlined_call_operand.vmem [shape: f32[1,128], index: 2, kind: input, shape index: {}]   ;;  %s1291_s0 = inlined_call_operand.vmem [shape: bf16[128,128], index: 0, kind: input, shape index: {}]   ;;  %s1292_s3 = inlined_call_operand.vmem [shape: bf16[128,128], index: 3, kind: output, shape index: {}]  }
   0x1   :  { %v646_v0 = vld [vmem:[%s1289_s1 + $0x38] sm:$0xff]  ;;  %v645_v1 = vld [vmem:[%s1289_s1 + $0x30] sm:$0xff]  ;;  %v644_v2 = vld [vmem:[%s1289_s1 + $0x28] sm:$0xff] }
   0x2   :  { %146 = vmatpush.bf16.msra.mxu0 %v646_v0  ;;  %694 = vmatpush.bf16.msra.mxu1 %v646_v0  ;;  %v643_v3 = vld [vmem:[%s1289_s1 + $0x20] sm:$0xff]  ;;  %v642_v4 = vld [vmem:[%s1289_s1 + $0x18] sm:$0xff]  ;;  %v641_v5 = vld [vmem:[%s1289_s1 + $0x10] sm:$0xff] }
   0x3   :  { %695 = vmatpush.bf16.msra.mxu2 %v646_v0  ;;  %696 = vmatpush.bf16.msra.mxu3 %v646_v0  ;;  %v640_v6 = vld [vmem:[%s1289_s1 + $0x8] sm:$0xff]  ;;  %v639_v7 = vld [vmem:[%s1289_s1] sm:$0xff]  ;;  %v633_v9 = vld [vmem:[%s1291_s0 + $0x10] sm:$0xff] }
   0x4   :  { %v631_v8 = vld [vmem:[%s1291_s0] sm:$0xff]  ;;  %v637_v11 = vld [vmem:[%s1291_s0 + $0x30] sm:$0xff]  ;;  %v632_v12 = vld [vmem:[%s1291_s0 + $0x8] sm:$0xff] }
   0x5   :  { %v635_v10 = vld [vmem:[%s1291_s0 + $0x20] sm:$0xff]  ;;  %v634_v13 = vld [vmem:[%s1291_s0 + $0x18] sm:$0xff]  ;;  %v636_v14 = vld [vmem:[%s1291_s0 + $0x28] sm:$0xff] }
   0x6   :  { %147 = vmatpush.bf16.msra.mxu0 %v645_v1  ;;  %697 = vmatpush.bf16.msra.mxu1 %v645_v1  ;;  %v638_v15 = vld [vmem:[%s1291_s0 + $0x38] sm:$0xff]  ;;  %v854_v16 = vld [vmem:[%s1290_s2] ss:$0 sm:$0xff] }
   0x7   :  { %698 = vmatpush.bf16.msra.mxu2 %v645_v1  ;;  %699 = vmatpush.bf16.msra.mxu3 %v645_v1 }
   0xa   :  { %148 = vmatpush.bf16.msra.mxu0 %v644_v2  ;;  %700 = vmatpush.bf16.msra.mxu1 %v644_v2 }
   0xb   :  { %701 = vmatpush.bf16.msra.mxu2 %v644_v2  ;;  %702 = vmatpush.bf16.msra.mxu3 %v644_v2 }
   0xe   :  { %149 = vmatpush.bf16.msra.mxu0 %v643_v3  ;;  %703 = vmatpush.bf16.msra.mxu1 %v643_v3 }
   0xf   :  { %704 = vmatpush.bf16.msra.mxu2 %v643_v3  ;;  %705 = vmatpush.bf16.msra.mxu3 %v643_v3 }
  0x12   :  { %150 = vmatpush.bf16.msra.mxu0 %v642_v4  ;;  %706 = vmatpush.bf16.msra.mxu1 %v642_v4 }
  0x13   :  { %707 = vmatpush.bf16.msra.mxu2 %v642_v4  ;;  %708 = vmatpush.bf16.msra.mxu3 %v642_v4 }
  0x16   :  { %151 = vmatpush.bf16.msra.mxu0 %v641_v5  ;;  %709 = vmatpush.bf16.msra.mxu1 %v641_v5 }
  0x17   :  { %710 = vmatpush.bf16.msra.mxu2 %v641_v5  ;;  %711 = vmatpush.bf16.msra.mxu3 %v641_v5 }
  0x1a   :  { %152 = vmatpush.bf16.msra.mxu0 %v640_v6  ;;  %712 = vmatpush.bf16.msra.mxu1 %v640_v6 }
  0x1b   :  { %713 = vmatpush.bf16.msra.mxu2 %v640_v6  ;;  %714 = vmatpush.bf16.msra.mxu3 %v640_v6 }
  0x1e   :  { %153 = vmatpush.bf16.msra.mxu0 %v639_v7  ;;  %715 = vmatpush.bf16.msra.mxu1 %v639_v7 }
  0x1f   :  { %716 = vmatpush.bf16.msra.mxu2 %v639_v7  ;;  %717 = vmatpush.bf16.msra.mxu3 %v639_v7 }
  0x21   :  { %154 = vmatmul.bf16.vlgmr.msra.gmra.mxu0 %v631_v8  ;;  %164 = vmatmul.bf16.vlgmr.msra.gmra.mxu1 %v633_v9 }
  0x22   :  { %174 = vmatmul.bf16.vlgmr.msra.gmra.mxu2 %v635_v10  ;;  %184 = vmatmul.bf16.vlgmr.msra.gmra.mxu3 %v637_v11 }
  0x31   :  { %159 = vmatmul.bf16.gmra.mxu0 %v632_v12  ;;  %169 = vmatmul.bf16.gmra.mxu1 %v634_v13 }
  0x32   :  { %179 = vmatmul.bf16.gmra.mxu2 %v636_v14  ;;  %189 = vmatmul.bf16.gmra.mxu3 %v638_v15 }
  0x9e   :  { %v155_v17 = vpop.f32.mrf.mxu0  ;;  %v165_v18 = vpop.f32.mrf.mxu1 }
  0x9f   :  { %v857_v19 = vadd.f32 %v854_v16, %v155_v17  ;;  %v860_v20 = vadd.f32 %v854_v16, %v165_v18 }
  0xa1   :  { %v615_v21 = vmul.f32 -1.442695, %v857_v19  ;;  %v619_v22 = vmul.f32 -1.442695, %v860_v20 }
  0xa3   :  { %719 = vpow2.f32 %v615_v21 }
  0xa4   :  { %721 = vpow2.f32 %v619_v22 }
  0xa5   :  { %v175_v23 = vpop.f32.mrf.mxu2  ;;  %v185_v24 = vpop.f32.mrf.mxu3 }
  0xa6   :  { %v865_v25 = vadd.f32 %v854_v16, %v175_v23  ;;  %v868_v26 = vadd.f32 %v854_v16, %v185_v24  ;;  %v157_v27 = vpop.f32.mrf.mxu0  ;;  %v167_v28 = vpop.f32.mrf.mxu1 }
  0xa7   :  { %v871_v29 = vadd.f32 %v854_v16, %v157_v27  ;;  %v874_v30 = vadd.f32 %v854_v16, %v167_v28 }
  0xa8   :  { %v623_v31 = vmul.f32 -1.442695, %v865_v25  ;;  %v627_v32 = vmul.f32 -1.442695, %v868_v26 }
  0xa9   :  { %v720_v33 = vpop.eup %719  ;;  %v616_v36 = vmul.f32 -1.442695, %v871_v29  ;;  %v620_v38 = vmul.f32 -1.442695, %v874_v30 }
  0xaa   :  { %v722_v34 = vpop.eup %721  ;;  %v878_v35 = vadd.f32 1.0, %v720_v33  ;;  %723 = vpow2.f32 %v623_v31 }
  0xab   :  { %v881_v37 = vadd.f32 1.0, %v722_v34  ;;  %725 = vpow2.f32 %v627_v32 }
  0xac   :  { %727 = vrcp.f32 %v878_v35  ;;  %v268_v51 = vand.u32 2147483647, %v878_v35  ;;  %v270_v53 = vand.u32 2147483648, %v878_v35  ;;  %vm264_vm0 = vweird.f32 %v878_v35 }
  0xad   :  { %729 = vrcp.f32 %v881_v37  ;;  %v177_v39 = vpop.f32.mrf.mxu2  ;;  %v187_v40 = vpop.f32.mrf.mxu3  ;;  %vm324_vm1 = vweird.f32 %v881_v37  ;;  %v328_v61 = vand.u32 2147483647, %v881_v37  ;;  %v330_v62 = vand.u32 2147483648, %v881_v37 }
  0xae   :  { %731 = vpow2.f32 %v616_v36  ;;  %v887_v41 = vadd.f32 %v854_v16, %v177_v39  ;;  %v890_v43 = vadd.f32 %v854_v16, %v187_v40  ;;  %v160_v56 = vpop.f32.mrf.mxu0  ;;  %v170_v59 = vpop.f32.mrf.mxu1  ;;  %vm915_vm2 = vcmp.eq.f32.partialorder %v268_v51, 8.507059e+37 }
  0xaf   :  { %733 = vpow2.f32 %v620_v38  ;;  %v924_v3 = vadd.f32 %v854_v16, %v160_v56  ;;  %v271_v4 = vor.u32 1.1754944e-38, %v270_v53  ;;  %v928_v6 = vadd.f32 %v854_v16, %v170_v59 }
  0xb0   :  { %v724_v42 = vpop.eup %723  ;;  %v624_v48 = vmul.f32 -1.442695, %v887_v41  ;;  %v628_v55 = vmul.f32 -1.442695, %v890_v43  ;;  %vm936_vm4 = vcmp.eq.f32.partialorder %v328_v61, 8.507059e+37  ;;  %v331_v11 = vor.u32 1.1754944e-38, %v330_v62 }
  0xb1   :  { %v726_v44 = vpop.eup %725  ;;  %v892_v45 = vadd.f32 1.0, %v724_v42  ;;  %v617_v17 = vmul.f32 -1.442695, %v924_v3  ;;  %v621_v28 = vmul.f32 -1.442695, %v928_v6 }
  0xb2   :  { %v894_v46 = vpop.eup %727  ;;  %v896_v47 = vadd.f32 1.0, %v726_v44 }
  0xb3   :  { %v899_v49 = vpop.eup %729  ;;  %v260_v50 = vmul.f32 %v894_v46, %v878_v35  ;;  %735 = vrcp.f32 %v892_v45  ;;  %vm265_vm3 = vweird.f32 %v894_v46  ;;  %v390_v9 = vand.u32 2147483648, %v892_v45 }
  0xb4   :  { %v732_v52 = vpop.eup %731  ;;  %v320_v54 = vmul.f32 %v899_v49, %v881_v37  ;;  %737 = vrcp.f32 %v896_v47  ;;  %v450_v13 = vand.u32 2147483648, %v896_v47  ;;  %vm325_vm5 = vweird.f32 %v899_v49  ;;  %vm951_vm6 = vmor %vm264_vm0, %vm265_vm3 }
  0xb5   :  { %v734_v57 = vpop.eup %733  ;;  %v261_v58 = vsub.f32 1.0, %v260_v50  ;;  %739 = vpow2.f32 %v624_v48  ;;  %v919_v1 = vadd.f32 1.0, %v732_v52  ;;  %v180_v18 = vpop.f32.mrf.mxu2  ;;  %v388_v24 = vand.u32 2147483647, %v892_v45  ;;  %vm971_vm8 = vmor %vm324_vm1, %vm325_vm5 }
  0xb6   :  { %v321_v60 = vsub.f32 1.0, %v320_v54  ;;  %v921_v2 = vadd.f32 1.0, %v734_v57  ;;  %741 = vpow2.f32 %v628_v55  ;;  %vm384_vm7 = vweird.f32 %v892_v45 }
  0xb7   :  { %v262_v63 = vmul.f32 %v894_v46, %v261_v58  ;;  %743 = vrcp.f32 %v919_v1  ;;  %v963_v32 = vor.u32 1.1754944e-38, %v390_v9  ;;  %v448_v33 = vand.u32 2147483647, %v896_v47 }
  0xb8   :  { %v322_v5 = vmul.f32 %v899_v49, %v321_v60  ;;  %745 = vrcp.f32 %v921_v2  ;;  %v283_v34 = vand.u32 2147483647, %v919_v1  ;;  %v975_v39 = vor.u32 1.1754944e-38, %v450_v13 }
  0xb9   :  { %v930_v7 = vpop.eup %735  ;;  %v263_v8 = vadd.f32 %v894_v46, %v262_v63  ;;  %vm279_vm9 = vweird.f32 %v919_v1  ;;  %v979_v40 = vadd.f32 %v854_v16, %v180_v18  ;;  %vm444_vm11 = vweird.f32 %v896_v47 }
  0xba   :  { %v380_v12 = vmul.f32 %v930_v7, %v892_v45  ;;  %v943_v14 = vpop.eup %737  ;;  %v323_v15 = vadd.f32 %v899_v49, %v322_v5  ;;  %vm385_vm10 = vweird.f32 %v930_v7  ;;  %747 = vpow2.f32 %v617_v17 }
  0xbb   :  { %v740_v21 = vpop.eup %739  ;;  %v440_v27 = vmul.f32 %v943_v14, %v896_v47  ;;  %v267_v31 = vsel %vm951_vm6, %v894_v46, %v263_v8  ;;  %v285_v51 = vand.u32 2147483648, %v919_v1  ;;  %vm993_vm12 = vcmp.eq.f32.partialorder %v283_v34, 8.507059e+37  ;;  %vm1028_vm3 = vmor %vm384_vm7, %vm385_vm10  ;;  %v190_v47 = vpop.f32.mrf.mxu3 }
  0xbc   :  { %v381_v23 = vsub.f32 1.0, %v380_v12  ;;  %v742_v35 = vpop.eup %741  ;;  %v327_v44 = vsel %vm971_vm8, %v899_v49, %v323_v15  ;;  %v986_v37 = vadd.f32 1.0, %v740_v21  ;;  %v272_v46 = vsel %vm915_vm2, %v271_v4, %v267_v31 }
  0xbd   :  { %v441_v38 = vsub.f32 1.0, %v440_v27  ;;  %v744_v42 = vpop.eup %743  ;;  %v343_v49 = vand.u32 2147483647, %v921_v2  ;;  %v999_v54 = vadd.f32 1.0, %v742_v35  ;;  %v332_v55 = vsel %vm936_vm4, %v331_v11, %v327_v44 }
  0xbe   :  { %v382_v48 = vmul.f32 %v930_v7, %v381_v23  ;;  %v275_v50 = vmul.f32 %v744_v42, %v919_v1  ;;  %v746_v52 = vpop.eup %745  ;;  %749 = vrcp.f32 %v986_v37  ;;  %vm1003_vm13 = vcmp.eq.f32.partialorder %v388_v24, 8.507059e+37 }
  0xbf   :  { %v442_v57 = vmul.f32 %v943_v14, %v441_v38  ;;  %v335_v59 = vmul.f32 %v746_v52, %v921_v2  ;;  %v499_v60 = vmul.f32 %v272_v46, %v857_v19  ;;  %vm445_vm14 = vweird.f32 %v943_v14 }
  0xc0   :  { %v276_v58 = vsub.f32 1.0, %v275_v50  ;;  %vm339_vm15 = vweird.f32 %v921_v2  ;;  %v345_v61 = vand.u32 2147483648, %v921_v2  ;;  %v383_v62 = vadd.f32 %v930_v7, %v382_v48  ;;  %v748_v5 = vpop.eup %747  ;;  %vm1045_vm7 = vmor %vm444_vm11, %vm445_vm14 }
  0xc1   :  { %vm1014_vm0 = vcmp.eq.f32.partialorder %v448_v33, 8.507059e+37  ;;  %vm280_vm1 = vweird.f32 %v744_v42  ;;  %v336_v4 = vsub.f32 1.0, %v335_v59  ;;  %v503_v8 = vmul.f32 %v332_v55, %v860_v20  ;;  %v182_v59 = vpop.f32.mrf.mxu2 }
  0xc2   :  { %v277_v0 = vmul.f32 %v744_v42, %v276_v58  ;;  %v286_v9 = vor.u32 1.1754944e-38, %v285_v51  ;;  %vm1019_vm2 = vcmp.eq.f32.partialorder %v343_v49, 8.507059e+37  ;;  %751 = vrcp.f32 %v999_v54  ;;  %vm281_vm5 = vmor %vm279_vm9, %vm280_vm1  ;;  %v172_v49 = vpop.f32.mrf.mxu1 }
  0xc3   :  { %v443_v11 = vadd.f32 %v943_v14, %v442_v57  ;;  %v337_v13 = vmul.f32 %v746_v52, %v336_v4  ;;  %vm340_vm4 = vweird.f32 %v746_v52  ;;  %v346_v15 = vor.u32 1.1754944e-38, %v345_v61 }
  0xc4   :  { %v278_v12 = vadd.f32 %v744_v42, %v277_v0  ;;  %v750_v20 = vpop.eup %749  ;;  %vm399_vm6 = vweird.f32 %v986_v37  ;;  %v1036_v17 = vadd.f32 1.0, %v748_v5  ;;  %753 = vpow2.f32 %v621_v28  ;;  %vm341_vm8 = vmor %vm339_vm15, %vm340_vm4 }
  0xc5   :  { %v387_v45 = vsel %vm1028_vm3, %v930_v7, %v383_v62  ;;  %v338_v21 = vadd.f32 %v746_v52, %v337_v13  ;;  %v395_v22 = vmul.f32 %v750_v20, %v986_v37  ;;  %v403_v7 = vand.u32 2147483647, %v986_v37 }
  0xc6   :  { %v282_v1 = vsel %vm281_vm5, %v744_v42, %v278_v12  ;;  %v405_v24 = vand.u32 2147483648, %v986_v37  ;;  %755 = vrcp.f32 %v1036_v17  ;;  %v447_v27 = vsel %vm1045_vm7, %v943_v14, %v443_v11  ;;  %v192_v12 = vpop.f32.mrf.mxu3 }
  0xc7   :  { %v287_v23 = vsel %vm993_vm12, %v286_v9, %v282_v1  ;;  %v342_v31 = vsel %vm341_vm8, %v746_v52, %v338_v21  ;;  %v396_v33 = vsub.f32 1.0, %v395_v22  ;;  %v392_v2 = vsel %vm1003_vm13, %v963_v32, %v387_v45 }
  0xc8   :  { %v500_v28 = vmul.f32 %v287_v23, %v871_v29  ;;  %v752_v34 = vpop.eup %751  ;;  %v347_v35 = vsel %vm1019_vm2, %v346_v15, %v342_v31  ;;  %vm400_vm9 = vweird.f32 %v750_v20  ;;  %v625_v36 = vmul.f32 -1.442695, %v979_v40  ;;  %v162_v29 = vpop.f32.mrf.mxu0 }
  0xc9   :  { %v504_v42 = vmul.f32 %v347_v35, %v874_v30  ;;  %v397_v44 = vmul.f32 %v750_v20, %v396_v33  ;;  %v455_v14 = vmul.f32 %v752_v34, %v999_v54  ;;  %v452_v48 = vsel %vm1014_vm0, %v975_v39, %v447_v27  ;;  %vm401_vm11 = vmor %vm399_vm6, %vm400_vm9 }
  0xca   :  { %v650_v38 = vpack.c.bf16 %v500_v28, %v499_v60  ;;  %v754_v46 = vpop.eup %753  ;;  %vm1072_vm10 = vcmp.eq.f32.partialorder %v403_v7, 8.507059e+37  ;;  %v406_v50 = vor.u32 1.1754944e-38, %v405_v24  ;;  %757 = vpow2.f32 %v625_v36 }
  0xcb   :  { %v660_v30 = vpack.c.bf16 %v504_v42, %v503_v8  ;;  %v398_v51 = vadd.f32 %v750_v20, %v397_v44  ;;  %v456_v52 = vsub.f32 1.0, %v455_v14  ;;  %v1079_v53 = vadd.f32 1.0, %v754_v46 }
  0xcc   :  { %651 = vst [vmem:[%s1292_s3] sm:$0xff] %v650_v38   ;;  %v1081_v55 = vpop.eup %755  ;;  %v463_v39 = vand.u32 2147483647, %v999_v54  ;;  %v465_v56 = vand.u32 2147483648, %v999_v54  ;;  %v1089_v57 = vadd.f32 %v854_v16, %v190_v47  ;;  %v1092_v58 = vadd.f32 %v854_v16, %v162_v29 }
  0xcd   :  { %688 = vst [vmem:[%s1292_s3 + $0x10] sm:$0xff] %v660_v30   ;;  %v402_v60 = vsel %vm401_vm11, %v750_v20, %v398_v51  ;;  %v457_v61 = vmul.f32 %v752_v34, %v456_v52  ;;  %vm460_vm12 = vweird.f32 %v752_v34  ;;  %v290_v37 = vmul.f32 %v1081_v55, %v1036_v17 }
  0xce   :  { %v507_v62 = vmul.f32 %v392_v2, %v865_v25  ;;  %v407_v63 = vsel %vm1072_vm10, %v406_v50, %v402_v60  ;;  %759 = vrcp.f32 %v1079_v53  ;;  %v1104_v0 = vadd.f32 %v854_v16, %v172_v49 }
  0xcf   :  { %v508_v4 = vmul.f32 %v407_v63, %v887_v41  ;;  %v458_v5 = vadd.f32 %v752_v34, %v457_v61  ;;  %vm459_vm13 = vweird.f32 %v999_v54  ;;  %v1109_v8 = vadd.f32 %v854_v16, %v182_v59 }
  0xd0   :  { %v758_v9 = vpop.eup %757  ;;  %v511_v19 = vmul.f32 %v452_v48, %v868_v26  ;;  %vm461_vm14 = vmor %vm459_vm13, %vm460_vm12  ;;  %v466_v25 = vor.u32 1.1754944e-38, %v465_v56  ;;  %v629_v10 = vmul.f32 -1.442695, %v1089_v57  ;;  %v618_v11 = vmul.f32 -1.442695, %v1092_v58 }
  0xd1   :  { %v670_v13 = vpack.c.bf16 %v508_v4, %v507_v62  ;;  %v462_v20 = vsel %vm461_vm14, %v752_v34, %v458_v5  ;;  %vm464_vm15 = vcmp.eq.f32.partialorder %v463_v39, 8.507059e+37  ;;  %v291_v41 = vsub.f32 1.0, %v290_v37 }
  0xd2   :  { %v467_v15 = vsel %vm464_vm15, %v466_v25, %v462_v20  ;;  %v1114_v45 = vadd.f32 1.0, %v758_v9  ;;  %761 = vpow2.f32 %v629_v10  ;;  %v622_v54 = vmul.f32 -1.442695, %v1104_v0 }
  0xd3   :  { %690 = vst [vmem:[%s1292_s3 + $0x20] sm:$0xff] %v670_v13   ;;  %v512_v26 = vmul.f32 %v467_v15, %v890_v43  ;;  %763 = vpow2.f32 %v618_v11  ;;  %v626_v18 = vmul.f32 -1.442695, %v1109_v8  ;;  %v1123_v1 = vadd.f32 %v854_v16, %v192_v12 }
  0xd4   :  { %v1125_v21 = vpop.eup %759  ;;  %765 = vrcp.f32 %v1114_v45  ;;  %v292_v7 = vmul.f32 %v1081_v55, %v291_v41  ;;  %vm294_vm0 = vweird.f32 %v1036_v17  ;;  %v298_v27 = vand.u32 2147483647, %v1036_v17 }
  0xd5   :  { %v680_v22 = vpack.c.bf16 %v512_v26, %v511_v19  ;;  %v350_v23 = vmul.f32 %v1125_v21, %v1079_v53  ;;  %767 = vpow2.f32 %v622_v54  ;;  %v630_v43 = vmul.f32 -1.442695, %v1123_v1 }
  0xd6   :  { %769 = vpow2.f32 %v626_v18  ;;  %v293_v33 = vadd.f32 %v1081_v55, %v292_v7  ;;  %vm295_vm1 = vweird.f32 %v1081_v55  ;;  %v300_v34 = vand.u32 2147483648, %v1036_v17 }
  0xd7   :  { %692 = vst [vmem:[%s1292_s3 + $0x30] sm:$0xff] %v680_v22   ;;  %v351_v24 = vsub.f32 1.0, %v350_v23  ;;  %771 = vpow2.f32 %v630_v43  ;;  %v358_v42 = vand.u32 2147483647, %v1079_v53  ;;  %vm1154_vm2 = vmor %vm294_vm0, %vm295_vm1  ;;  %v360_v29 = vand.u32 2147483648, %v1079_v53 }
  0xd8   :  { %v762_v16 = vpop.eup %761  ;;  %v297_v48 = vsel %vm1154_vm2, %v1081_v55, %v293_v33  ;;  %vm299_vm3 = vcmp.eq.f32.partialorder %v298_v27, 8.507059e+37  ;;  %v301_v32 = vor.u32 1.1754944e-38, %v300_v34  ;;  %v418_v50 = vand.u32 2147483647, %v1114_v45 }
  0xd9   :  { %v764_v47 = vpop.eup %763  ;;  %v1137_v28 = vadd.f32 1.0, %v762_v16  ;;  %v352_v38 = vmul.f32 %v1125_v21, %v351_v24  ;;  %vm354_vm4 = vweird.f32 %v1079_v53  ;;  %v420_v51 = vand.u32 2147483648, %v1114_v45 }
  0xda   :  { %v1139_v31 = vpop.eup %765  ;;  %v1144_v2 = vadd.f32 1.0, %v764_v47  ;;  %vm355_vm5 = vweird.f32 %v1125_v21  ;;  %vm1170_vm6 = vcmp.eq.f32.partialorder %v358_v42, 8.507059e+37  ;;  %v302_v59 = vsel %vm299_vm3, %v301_v32, %v297_v48 }
  0xdb   :  { %v410_v35 = vmul.f32 %v1139_v31, %v1114_v45  ;;  %773 = vrcp.f32 %v1137_v28  ;;  %v768_v36 = vpop.eup %767  ;;  %v353_v49 = vadd.f32 %v1125_v21, %v352_v38  ;;  %v361_v60 = vor.u32 1.1754944e-38, %v360_v29  ;;  %vm1191_vm9 = vmor %vm354_vm4, %vm355_vm5 }
  0xdc   :  { %775 = vrcp.f32 %v1144_v2  ;;  %v770_v44 = vpop.eup %769  ;;  %v1166_v52 = vadd.f32 1.0, %v768_v36  ;;  %vm414_vm7 = vweird.f32 %v1114_v45  ;;  %vm1180_vm8 = vcmp.eq.f32.partialorder %v418_v50, 8.507059e+37 }
  0xdd   :  { %v411_v46 = vsub.f32 1.0, %v410_v35  ;;  %v772_v30 = vpop.eup %771  ;;  %v1174_v55 = vadd.f32 1.0, %v770_v44  ;;  %vm415_vm10 = vweird.f32 %v1139_v31  ;;  %v421_v9 = vor.u32 1.1754944e-38, %v420_v51 }
  0xde   :  { %777 = vrcp.f32 %v1166_v52  ;;  %v1187_v63 = vadd.f32 1.0, %v772_v30  ;;  %v357_v25 = vsel %vm1191_vm9, %v1125_v21, %v353_v49  ;;  %v313_v11 = vand.u32 2147483647, %v1144_v2  ;;  %vm1208_vm12 = vmor %vm414_vm7, %vm415_vm10 }
  0xdf   :  { %v412_v17 = vmul.f32 %v1139_v31, %v411_v46  ;;  %779 = vrcp.f32 %v1174_v55  ;;  %v315_v53 = vand.u32 2147483648, %v1144_v2  ;;  %v501_v12 = vmul.f32 %v302_v59, %v924_v3 }
  0xe0   :  { %vm474_vm11 = vweird.f32 %v1137_v28  ;;  %v478_v13 = vand.u32 2147483647, %v1137_v28  ;;  %v480_v15 = vand.u32 2147483648, %v1137_v28  ;;  %vm309_vm13 = vweird.f32 %v1144_v2 }
  0xe1   :  { %v1176_v56 = vpop.eup %773  ;;  %v413_v5 = vadd.f32 %v1139_v31, %v412_v17  ;;  %v373_v54 = vand.u32 2147483647, %v1166_v52  ;;  %781 = vrcp.f32 %v1187_v63  ;;  %v362_v26 = vsel %vm1170_vm6, %v361_v60, %v357_v25 }
  0xe2   :  { %v776_v61 = vpop.eup %775  ;;  %v470_v62 = vmul.f32 %v1176_v56, %v1137_v28  ;;  %vm1222_vm15 = vcmp.eq.f32.partialorder %v313_v11, 8.507059e+37  ;;  %v316_v7 = vor.u32 1.1754944e-38, %v315_v53  ;;  %vm475_vm0 = vweird.f32 %v1176_v56 }
  0xe3   :  { %v305_v19 = vmul.f32 %v776_v61, %v1144_v2  ;;  %v417_v45 = vsel %vm1208_vm12, %v1139_v31, %v413_v5  ;;  %vm310_vm14 = vweird.f32 %v776_v61  ;;  %vm369_vm1 = vweird.f32 %v1166_v52  ;;  %vm1254_vm7 = vmor %vm474_vm11, %vm475_vm0 }
  0xe4   :  { %v471_v10 = vsub.f32 1.0, %v470_v62  ;;  %v778_v3 = vpop.eup %777  ;;  %v422_v47 = vsel %vm1180_vm8, %v421_v9, %v417_v45  ;;  %vm311_vm2 = vmor %vm309_vm13, %vm310_vm14  ;;  %vm1234_vm3 = vcmp.eq.f32.partialorder %v373_v54, 8.507059e+37  ;;  %v375_v33 = vand.u32 2147483648, %v1166_v52 }
  0xe5   :  { %v306_v20 = vsub.f32 1.0, %v305_v19  ;;  %v780_v21 = vpop.eup %779  ;;  %v365_v43 = vmul.f32 %v778_v3, %v1166_v52  ;;  %vm1239_vm4 = vcmp.eq.f32.partialorder %v478_v13, 8.507059e+37  ;;  %v433_v38 = vand.u32 2147483647, %v1174_v55 }
  0xe6   :  { %v472_v22 = vmul.f32 %v1176_v56, %v471_v10  ;;  %v425_v24 = vmul.f32 %v780_v21, %v1174_v55  ;;  %v435_v42 = vand.u32 2147483648, %v1174_v55  ;;  %vm370_vm5 = vweird.f32 %v778_v3 }
  0xe7   :  { %v307_v18 = vmul.f32 %v776_v61, %v306_v20  ;;  %v366_v27 = vsub.f32 1.0, %v365_v43  ;;  %v782_v44 = vpop.eup %781  ;;  %vm430_vm6 = vweird.f32 %v780_v21  ;;  %v376_v17 = vor.u32 1.1754944e-38, %v375_v33  ;;  %vm371_vm9 = vmor %vm369_vm1, %vm370_vm5 }
  0xe8   :  { %v426_v36 = vsub.f32 1.0, %v425_v24  ;;  %v473_v2 = vadd.f32 %v1176_v56, %v472_v22  ;;  %v485_v32 = vmul.f32 %v782_v44, %v1187_v63  ;;  %vm429_vm8 = vweird.f32 %v1174_v55 }
  0xe9   :  { %v308_v16 = vadd.f32 %v776_v61, %v307_v18  ;;  %v367_v29 = vmul.f32 %v778_v3, %v366_v27  ;;  %v493_v51 = vand.u32 2147483647, %v1187_v63  ;;  %vm434_vm10 = vcmp.eq.f32.partialorder %v433_v38, 8.507059e+37  ;;  %vm431_vm11 = vmor %vm429_vm8, %vm430_vm6 }
  0xea   :  { %v427_v48 = vmul.f32 %v780_v21, %v426_v36  ;;  %v486_v39 = vsub.f32 1.0, %v485_v32  ;;  %v477_v28 = vsel %vm1254_vm7, %v1176_v56, %v473_v2  ;;  %v436_v60 = vor.u32 1.1754944e-38, %v435_v42 }
  0xeb   :  { %v312_v35 = vsel %vm311_vm2, %v776_v61, %v308_v16  ;;  %v368_v30 = vadd.f32 %v778_v3, %v367_v29  ;;  %v495_v61 = vand.u32 2147483648, %v1187_v63  ;;  %vm490_vm12 = vweird.f32 %v782_v44 }
  0xec   :  { %v317_v14 = vsel %vm1222_vm15, %v316_v7, %v312_v35  ;;  %v487_v37 = vmul.f32 %v782_v44, %v486_v39  ;;  %v505_v62 = vmul.f32 %v362_v26, %v928_v6  ;;  %v481_v4 = vor.u32 1.1754944e-38, %v480_v15 }
  0xed   :  { %v502_v46 = vmul.f32 %v317_v14, %v1092_v58  ;;  %v428_v58 = vadd.f32 %v780_v21, %v427_v48  ;;  %v372_v59 = vsel %vm371_vm9, %v778_v3, %v368_v30  ;;  %v509_v9 = vmul.f32 %v422_v47, %v979_v40 }
  0xee   :  { %v377_v52 = vsel %vm1234_vm3, %v376_v17, %v372_v59  ;;  %v488_v25 = vadd.f32 %v782_v44, %v487_v37  ;;  %vm489_vm13 = vweird.f32 %v1187_v63  ;;  %v482_v10 = vsel %vm1239_vm4, %v481_v4, %v477_v28 }
  0xef   :  { %v655_v49 = vpack.c.bf16 %v502_v46, %v501_v12  ;;  %v432_v55 = vsel %vm431_vm11, %v780_v21, %v428_v58  ;;  %v506_v56 = vmul.f32 %v377_v52, %v1104_v0  ;;  %vm491_vm14 = vmor %vm489_vm13, %vm490_vm12  ;;  %v496_v53 = vor.u32 1.1754944e-38, %v495_v61 }
  0xf0   :  { %v437_v5 = vsel %vm434_vm10, %v436_v60, %v432_v55  ;;  %v492_v13 = vsel %vm491_vm14, %v782_v44, %v488_v25  ;;  %vm494_vm15 = vcmp.eq.f32.partialorder %v493_v51, 8.507059e+37  ;;  %v513_v40 = vmul.f32 %v482_v10, %v1089_v57 }
  0xf1   :  { %687 = vst [vmem:[%s1292_s3 + $0x8] sm:$0xff] %v655_v49   ;;  %v510_v19 = vmul.f32 %v437_v5, %v1109_v8  ;;  %v665_v11 = vpack.c.bf16 %v506_v56, %v505_v62  ;;  %v497_v6 = vsel %vm494_vm15, %v496_v53, %v492_v13 }
  0xf2   :  { %v514_v0 = vmul.f32 %v497_v6, %v1123_v1 }
  0xf3   :  { %v675_v12 = vpack.c.bf16 %v510_v19, %v509_v9  ;;  %689 = vst [vmem:[%s1292_s3 + $0x18] sm:$0xff] %v665_v11  }
  0xf4   :  { %v685_v8 = vpack.c.bf16 %v514_v0, %v513_v40 }
  0xf5   :  { %691 = vst [vmem:[%s1292_s3 + $0x28] sm:$0xff] %v675_v12  }
  0xf6   :  { %693 = vst [vmem:[%s1292_s3 + $0x38] sm:$0xff] %v685_v8  }

// kernel: _forward_impl.6
= control target key start
LH: loop header
LB: loop body
LE: loop exit
PB: predicated region body
PF: predicated region fallthrough
CT: control target
= control target key end

     0   :  { %s387_s1 = inlined_call_operand.vmem [shape: bf16[128,128], index: 1, kind: input, shape index: {}]   ;;  %s388_s2 = inlined_call_operand.vmem [shape: f32[1,128], index: 2, kind: input, shape index: {}]   ;;  %s389_s0 = inlined_call_operand.vmem [shape: bf16[32,128], index: 0, kind: input, shape index: {}]   ;;  %s390_s3 = inlined_call_operand.vmem [shape: bf16[32,128], index: 3, kind: output, shape index: {}]  }
   0x1   :  { %v262_v0 = vld [vmem:[%s387_s1 + $0x38] sm:$0xff]  ;;  %v261_v1 = vld [vmem:[%s387_s1 + $0x30] sm:$0xff]  ;;  %v260_v2 = vld [vmem:[%s387_s1 + $0x28] sm:$0xff] }
   0x2   :  { %98 = vmatpush.bf16.msra.mxu0 %v262_v0  ;;  %274 = vmatpush.bf16.msra.mxu1 %v262_v0  ;;  %v259_v3 = vld [vmem:[%s387_s1 + $0x20] sm:$0xff]  ;;  %v258_v4 = vld [vmem:[%s387_s1 + $0x18] sm:$0xff]  ;;  %v257_v5 = vld [vmem:[%s387_s1 + $0x10] sm:$0xff] }
   0x3   :  { %v256_v6 = vld [vmem:[%s387_s1 + $0x8] sm:$0xff]  ;;  %v255_v7 = vld [vmem:[%s387_s1] sm:$0xff] }
   0x4   :  { %v253_v8 = vld [vmem:[%s389_s0] sm:$0xff]  ;;  %v254_v9 = vld [vmem:[%s389_s0 + $0x8] sm:$0xff] }
   0x5   :  { %v282_v10 = vld [vmem:[%s388_s2] ss:$0 sm:$0xff] }
   0x6   :  { %99 = vmatpush.bf16.msra.mxu0 %v261_v1  ;;  %275 = vmatpush.bf16.msra.mxu1 %v261_v1 }
   0xa   :  { %100 = vmatpush.bf16.msra.mxu0 %v260_v2  ;;  %276 = vmatpush.bf16.msra.mxu1 %v260_v2 }
   0xe   :  { %101 = vmatpush.bf16.msra.mxu0 %v259_v3  ;;  %277 = vmatpush.bf16.msra.mxu1 %v259_v3 }
  0x12   :  { %102 = vmatpush.bf16.msra.mxu0 %v258_v4  ;;  %278 = vmatpush.bf16.msra.mxu1 %v258_v4 }
  0x16   :  { %103 = vmatpush.bf16.msra.mxu0 %v257_v5  ;;  %279 = vmatpush.bf16.msra.mxu1 %v257_v5 }
  0x1a   :  { %104 = vmatpush.bf16.msra.mxu0 %v256_v6  ;;  %280 = vmatpush.bf16.msra.mxu1 %v256_v6 }
  0x1e   :  { %105 = vmatpush.bf16.msra.mxu0 %v255_v7  ;;  %281 = vmatpush.bf16.msra.mxu1 %v255_v7 }
  0x21   :  { %106 = vmatmul.bf16.vlgmr.msra.gmra.mxu0 %v253_v8  ;;  %111 = vmatmul.bf16.vlgmr.msra.gmra.mxu1 %v254_v9 }
  0x9e   :  { %v107_v11 = vpop.f32.mrf.mxu0  ;;  %v112_v12 = vpop.f32.mrf.mxu1 }
  0x9f   :  { %v352_v13 = vadd.f32 %v282_v10, %v107_v11  ;;  %v354_v14 = vadd.f32 %v282_v10, %v112_v12 }
  0xa1   :  { %v249_v15 = vmul.f32 -1.442695, %v352_v13  ;;  %v251_v16 = vmul.f32 -1.442695, %v354_v14 }
  0xa3   :  { %283 = vpow2.f32 %v249_v15 }
  0xa4   :  { %285 = vpow2.f32 %v251_v16 }
  0xa6   :  { %v109_v17 = vpop.f32.mrf.mxu0  ;;  %v114_v18 = vpop.f32.mrf.mxu1 }
  0xa7   :  { %v358_v19 = vadd.f32 %v282_v10, %v109_v17  ;;  %v360_v20 = vadd.f32 %v282_v10, %v114_v18 }
  0xa9   :  { %v284_v21 = vpop.eup %283  ;;  %v250_v22 = vmul.f32 -1.442695, %v358_v19  ;;  %v252_v25 = vmul.f32 -1.442695, %v360_v20 }
  0xaa   :  { %v286_v23 = vpop.eup %285  ;;  %v129_v24 = vadd.f32 1.0, %v284_v21 }
  0xab   :  { %v131_v26 = vadd.f32 1.0, %v286_v23  ;;  %287 = vpow2.f32 %v250_v22 }
  0xac   :  { %289 = vrcp.f32 %v129_v24  ;;  %vm138_vm1 = vweird.f32 %v129_v24  ;;  %v142_v42 = vand.u32 2147483647, %v129_v24  ;;  %v144_v43 = vand.u32 2147483648, %v129_v24 }
  0xad   :  { %291 = vrcp.f32 %v131_v26  ;;  %vm168_vm2 = vweird.f32 %v131_v26  ;;  %v172_v45 = vand.u32 2147483647, %v131_v26  ;;  %v174_v50 = vand.u32 2147483648, %v131_v26 }
  0xae   :  { %293 = vpow2.f32 %v252_v25  ;;  %vm143_vm6 = vcmp.eq.f32.partialorder %v142_v42, 8.507059e+37  ;;  %v145_v55 = vor.u32 1.1754944e-38, %v144_v43 }
  0xaf   :  { %v175_v1 = vor.u32 1.1754944e-38, %v174_v50  ;;  %vm173_vm12 = vcmp.eq.f32.partialorder %v172_v45, 8.507059e+37 }
  0xb1   :  { %v288_v27 = vpop.eup %287 }
  0xb2   :  { %v290_v28 = vpop.eup %289  ;;  %v130_v29 = vadd.f32 1.0, %v288_v27 }
  0xb3   :  { %v292_v30 = vpop.eup %291  ;;  %v134_v31 = vmul.f32 %v290_v28, %v129_v24  ;;  %vm139_vm0 = vweird.f32 %v290_v28 }
  0xb4   :  { %v294_v32 = vpop.eup %293  ;;  %v164_v33 = vmul.f32 %v292_v30, %v131_v26  ;;  %295 = vrcp.f32 %v130_v29  ;;  %v159_v47 = vand.u32 2147483648, %v130_v29  ;;  %vm364_vm3 = vmor %vm138_vm1, %vm139_vm0  ;;  %vm169_vm4 = vweird.f32 %v292_v30 }
  0xb5   :  { %v135_v34 = vsub.f32 1.0, %v134_v31  ;;  %v132_v35 = vadd.f32 1.0, %v294_v32  ;;  %v157_v54 = vand.u32 2147483647, %v130_v29  ;;  %vm153_vm7 = vweird.f32 %v130_v29  ;;  %vm371_vm8 = vmor %vm168_vm2, %vm169_vm4 }
  0xb6   :  { %v165_v36 = vsub.f32 1.0, %v164_v33  ;;  %v160_v59 = vor.u32 1.1754944e-38, %v159_v47 }
  0xb7   :  { %v136_v37 = vmul.f32 %v290_v28, %v135_v34  ;;  %297 = vrcp.f32 %v132_v35  ;;  %v187_v60 = vand.u32 2147483647, %v132_v35  ;;  %v189_v61 = vand.u32 2147483648, %v132_v35 }
  0xb8   :  { %v166_v39 = vmul.f32 %v292_v30, %v165_v36  ;;  %vm158_vm11 = vcmp.eq.f32.partialorder %v157_v54, 8.507059e+37  ;;  %vm183_vm13 = vweird.f32 %v132_v35 }
  0xb9   :  { %v137_v40 = vadd.f32 %v290_v28, %v136_v37  ;;  %v190_v8 = vor.u32 1.1754944e-38, %v189_v61  ;;  %vm188_vm15 = vcmp.eq.f32.partialorder %v187_v60, 8.507059e+37 }
  0xba   :  { %v296_v38 = vpop.eup %295  ;;  %v167_v49 = vadd.f32 %v292_v30, %v166_v39 }
  0xbb   :  { %v149_v41 = vmul.f32 %v296_v38, %v130_v29  ;;  %v141_v52 = vsel %vm364_vm3, %v290_v28, %v137_v40  ;;  %vm154_vm5 = vweird.f32 %v296_v38 }
  0xbc   :  { %v146_v62 = vsel %vm143_vm6, %v145_v55, %v141_v52  ;;  %v171_v63 = vsel %vm371_vm8, %v292_v30, %v167_v49  ;;  %vm155_vm9 = vmor %vm153_vm7, %vm154_vm5 }
  0xbd   :  { %v298_v44 = vpop.eup %297  ;;  %v150_v46 = vsub.f32 1.0, %v149_v41  ;;  %v193_v5 = vmul.f32 %v146_v62, %v352_v13  ;;  %v176_v6 = vsel %vm173_vm12, %v175_v1, %v171_v63 }
  0xbe   :  { %v179_v51 = vmul.f32 %v298_v44, %v132_v35  ;;  %vm184_vm10 = vweird.f32 %v298_v44  ;;  %v195_v12 = vmul.f32 %v176_v6, %v354_v14 }
  0xbf   :  { %v151_v53 = vmul.f32 %v296_v38, %v150_v46  ;;  %vm185_vm14 = vmor %vm183_vm13, %vm184_vm10 }
  0xc0   :  { %v180_v56 = vsub.f32 1.0, %v179_v51 }
  0xc1   :  { %v152_v58 = vadd.f32 %v296_v38, %v151_v53 }
  0xc2   :  { %v181_v0 = vmul.f32 %v298_v44, %v180_v56 }
  0xc3   :  { %v156_v2 = vsel %vm155_vm9, %v296_v38, %v152_v58 }
  0xc4   :  { %v161_v3 = vsel %vm158_vm11, %v160_v59, %v156_v2  ;;  %v182_v4 = vadd.f32 %v298_v44, %v181_v0 }
  0xc5   :  { %v194_v7 = vmul.f32 %v161_v3, %v358_v19 }
  0xc6   :  { %v186_v9 = vsel %vm185_vm14, %v298_v44, %v182_v4 }
  0xc7   :  { %v266_v10 = vpack.c.bf16 %v194_v7, %v193_v5  ;;  %v191_v11 = vsel %vm188_vm15, %v190_v8, %v186_v9 }
  0xc8   :  { %v196_v15 = vmul.f32 %v191_v11, %v360_v20 }
  0xc9   :  { %267 = vst [vmem:[%s390_s3] sm:$0xff] %v266_v10  }
  0xca   :  { %v271_v16 = vpack.c.bf16 %v196_v15, %v195_v12 }
  0xcc   :  { %273 = vst [vmem:[%s390_s3 + $0x8] sm:$0xff] %v271_v16  }

// kernel: _forward_impl.9
= control target key start
LH: loop header
LB: loop body
LE: loop exit
PB: predicated region body
PF: predicated region fallthrough
CT: control target
= control target key end

     0   :  { %s323_s1 = inlined_call_operand.vmem [shape: bf16[128,128], index: 1, kind: input, shape index: {}]   ;;  %s324_s2 = inlined_call_operand.vmem [shape: f32[1,128], index: 2, kind: input, shape index: {}]   ;;  %s325_s0 = inlined_call_operand.vmem [shape: bf16[64,128], index: 0, kind: input, shape index: {}]   ;;  %s326_s3 = inlined_call_operand.vmem [shape: f32[64,128], index: 3, kind: output, shape index: {}]  }
   0x1   :  { %v214_v0 = vld [vmem:[%s323_s1 + $0x38] sm:$0xff]  ;;  %v213_v1 = vld [vmem:[%s323_s1 + $0x30] sm:$0xff]  ;;  %v212_v2 = vld [vmem:[%s323_s1 + $0x28] sm:$0xff] }
   0x2   :  { %114 = vmatpush.bf16.msra.mxu0 %v214_v0  ;;  %215 = vmatpush.bf16.msra.mxu1 %v214_v0  ;;  %v211_v3 = vld [vmem:[%s323_s1 + $0x20] sm:$0xff]  ;;  %v210_v4 = vld [vmem:[%s323_s1 + $0x18] sm:$0xff]  ;;  %v209_v5 = vld [vmem:[%s323_s1 + $0x10] sm:$0xff] }
   0x3   :  { %216 = vmatpush.bf16.msra.mxu2 %v214_v0  ;;  %217 = vmatpush.bf16.msra.mxu3 %v214_v0  ;;  %v208_v6 = vld [vmem:[%s323_s1 + $0x8] sm:$0xff]  ;;  %v207_v7 = vld [vmem:[%s323_s1] sm:$0xff]  ;;  %v205_v10 = vld [vmem:[%s325_s0 + $0x10] sm:$0xff] }
   0x4   :  { %v203_v8 = vld [vmem:[%s325_s0] sm:$0xff]  ;;  %v204_v9 = vld [vmem:[%s325_s0 + $0x8] sm:$0xff]  ;;  %v206_v11 = vld [vmem:[%s325_s0 + $0x18] sm:$0xff] }
   0x5   :  { %v239_v12 = vld [vmem:[%s324_s2] ss:$0 sm:$0xff] }
   0x6   :  { %115 = vmatpush.bf16.msra.mxu0 %v213_v1  ;;  %218 = vmatpush.bf16.msra.mxu1 %v213_v1 }
   0x7   :  { %219 = vmatpush.bf16.msra.mxu2 %v213_v1  ;;  %220 = vmatpush.bf16.msra.mxu3 %v213_v1 }
   0xa   :  { %116 = vmatpush.bf16.msra.mxu0 %v212_v2  ;;  %221 = vmatpush.bf16.msra.mxu1 %v212_v2 }
   0xb   :  { %222 = vmatpush.bf16.msra.mxu2 %v212_v2  ;;  %223 = vmatpush.bf16.msra.mxu3 %v212_v2 }
   0xe   :  { %117 = vmatpush.bf16.msra.mxu0 %v211_v3  ;;  %224 = vmatpush.bf16.msra.mxu1 %v211_v3 }
   0xf   :  { %225 = vmatpush.bf16.msra.mxu2 %v211_v3  ;;  %226 = vmatpush.bf16.msra.mxu3 %v211_v3 }
  0x12   :  { %118 = vmatpush.bf16.msra.mxu0 %v210_v4  ;;  %227 = vmatpush.bf16.msra.mxu1 %v210_v4 }
  0x13   :  { %228 = vmatpush.bf16.msra.mxu2 %v210_v4  ;;  %229 = vmatpush.bf16.msra.mxu3 %v210_v4 }
  0x16   :  { %119 = vmatpush.bf16.msra.mxu0 %v209_v5  ;;  %230 = vmatpush.bf16.msra.mxu1 %v209_v5 }
  0x17   :  { %231 = vmatpush.bf16.msra.mxu2 %v209_v5  ;;  %232 = vmatpush.bf16.msra.mxu3 %v209_v5 }
  0x1a   :  { %120 = vmatpush.bf16.msra.mxu0 %v208_v6  ;;  %233 = vmatpush.bf16.msra.mxu1 %v208_v6 }
  0x1b   :  { %234 = vmatpush.bf16.msra.mxu2 %v208_v6  ;;  %235 = vmatpush.bf16.msra.mxu3 %v208_v6 }
  0x1e   :  { %121 = vmatpush.bf16.msra.mxu0 %v207_v7  ;;  %236 = vmatpush.bf16.msra.mxu1 %v207_v7 }
  0x1f   :  { %237 = vmatpush.bf16.msra.mxu2 %v207_v7  ;;  %238 = vmatpush.bf16.msra.mxu3 %v207_v7 }
  0x21   :  { %122 = vmatmul.bf16.vlgmr.msra.gmra.mxu0 %v203_v8  ;;  %127 = vmatmul.bf16.vlgmr.msra.gmra.mxu1 %v204_v9 }
  0x22   :  { %132 = vmatmul.bf16.vlgmr.msra.gmra.mxu2 %v205_v10  ;;  %137 = vmatmul.bf16.vlgmr.msra.gmra.mxu3 %v206_v11 }
  0x9e   :  { %v123_v13 = vpop.f32.mrf.mxu0  ;;  %v128_v14 = vpop.f32.mrf.mxu1 }
  0x9f   :  { %v124_v15 = vadd.f32 %v239_v12, %v123_v13  ;;  %v129_v16 = vadd.f32 %v239_v12, %v128_v14 }
  0xa1   :  { %143 = vst [vmem:[%s326_s3] sm:$0xff] %v124_v15 }
  0xa2   :  { %145 = vst [vmem:[%s326_s3 + $0x10] sm:$0xff] %v129_v16 }
  0xa5   :  { %v133_v17 = vpop.f32.mrf.mxu2  ;;  %v138_v18 = vpop.f32.mrf.mxu3 }
  0xa6   :  { %v134_v19 = vadd.f32 %v239_v12, %v133_v17  ;;  %v139_v20 = vadd.f32 %v239_v12, %v138_v18  ;;  %v125_v21 = vpop.f32.mrf.mxu0  ;;  %v130_v22 = vpop.f32.mrf.mxu1 }
  0xa7   :  { %v126_v23 = vadd.f32 %v239_v12, %v125_v21  ;;  %v131_v24 = vadd.f32 %v239_v12, %v130_v22 }
  0xa8   :  { %147 = vst [vmem:[%s326_s3 + $0x20] sm:$0xff] %v134_v19 }
  0xa9   :  { %149 = vst [vmem:[%s326_s3 + $0x30] sm:$0xff] %v139_v20 }
  0xaa   :  { %144 = vst [vmem:[%s326_s3 + $0x8] sm:$0xff] %v126_v23 }
  0xab   :  { %146 = vst [vmem:[%s326_s3 + $0x18] sm:$0xff] %v131_v24 }
  0xad   :  { %v135_v25 = vpop.f32.mrf.mxu2  ;;  %v140_v26 = vpop.f32.mrf.mxu3 }
  0xae   :  { %v136_v27 = vadd.f32 %v239_v12, %v135_v25  ;;  %v141_v28 = vadd.f32 %v239_v12, %v140_v26 }
  0xb0   :  { %148 = vst [vmem:[%s326_s3 + $0x28] sm:$0xff] %v136_v27 }
  0xb1   :  { %150 = vst [vmem:[%s326_s3 + $0x38] sm:$0xff] %v141_v28 }

// kernel: _forward_impl.7
= control target key start
LH: loop header
LB: loop body
LE: loop exit
PB: predicated region body
PF: predicated region fallthrough
CT: control target
= control target key end

     0   :  { %s577_s1 = inlined_call_operand.vmem [shape: bf16[256,128], index: 1, kind: input, shape index: {}]   ;;  %s578_s2 = inlined_call_operand.vmem [shape: f32[1,128], index: 2, kind: input, shape index: {}]   ;;  %s579_s0 = inlined_call_operand.vmem [shape: bf16[32,256], index: 0, kind: input, shape index: {}]   ;;  %s580_s3 = inlined_call_operand.vmem [shape: bf16[32,128], index: 3, kind: output, shape index: {}]  }
   0x1   :  { %v395_v0 = vld [vmem:[%s577_s1 + $0x38] sm:$0xff]  ;;  %v394_v2 = vld [vmem:[%s577_s1 + $0x30] sm:$0xff]  ;;  %v393_v4 = vld [vmem:[%s577_s1 + $0x28] sm:$0xff] }
   0x2   :  { %v403_v1 = vld [vmem:[%s577_s1 + $0x78] sm:$0xff]  ;;  %170 = vmatpush.bf16.msra.mxu0 %v395_v0  ;;  %415 = vmatpush.bf16.msra.mxu2 %v395_v0  ;;  %v402_v3 = vld [vmem:[%s577_s1 + $0x70] sm:$0xff]  ;;  %v401_v5 = vld [vmem:[%s577_s1 + $0x68] sm:$0xff] }
   0x3   :  { %189 = vmatpush.bf16.msra.mxu1 %v403_v1  ;;  %423 = vmatpush.bf16.msra.mxu3 %v403_v1  ;;  %v392_v6 = vld [vmem:[%s577_s1 + $0x20] sm:$0xff]  ;;  %v391_v8 = vld [vmem:[%s577_s1 + $0x18] sm:$0xff]  ;;  %v390_v10 = vld [vmem:[%s577_s1 + $0x10] sm:$0xff] }
   0x4   :  { %v400_v7 = vld [vmem:[%s577_s1 + $0x60] sm:$0xff]  ;;  %v399_v9 = vld [vmem:[%s577_s1 + $0x58] sm:$0xff]  ;;  %v398_v11 = vld [vmem:[%s577_s1 + $0x50] sm:$0xff] }
   0x5   :  { %v389_v12 = vld [vmem:[%s577_s1 + $0x8] sm:$0xff]  ;;  %v388_v14 = vld [vmem:[%s577_s1] sm:$0xff]  ;;  %v310_v18 = vld [vmem:[%s579_s0 + $0x10] sm:$0xf] }
   0x6   :  { %171 = vmatpush.bf16.msra.mxu0 %v394_v2  ;;  %416 = vmatpush.bf16.msra.mxu2 %v394_v2  ;;  %v397_v13 = vld [vmem:[%s577_s1 + $0x48] sm:$0xff]  ;;  %v396_v15 = vld [vmem:[%s577_s1 + $0x40] sm:$0xff]  ;;  %v387_v19 = vld [vmem:[%s579_s0 + $0x14] sm:$0xf0] }
   0x7   :  { %190 = vmatpush.bf16.msra.mxu1 %v402_v3  ;;  %424 = vmatpush.bf16.msra.mxu3 %v402_v3  ;;  %v302_v16 = vld [vmem:[%s579_s0] sm:$0xf]  ;;  %v385_v17 = vld [vmem:[%s579_s0 + $0x4] sm:$0xf0]  ;;  %v384_v20 = vld [vmem:[%s579_s0 + $0x4] sm:$0xf]  ;;  %v311_v25 = vor.u32 %v387_v19, %v310_v18 }
   0x8   :  { %v304_v21 = vld [vmem:[%s579_s0 + $0x8] sm:$0xf0]  ;;  %v386_v22 = vld [vmem:[%s579_s0 + $0x14] sm:$0xf]  ;;  %v312_v23 = vld [vmem:[%s579_s0 + $0x18] sm:$0xf0]  ;;  %v303_v24 = vor.u32 %v385_v17, %v302_v16 }
   0x9   :  { %v307_v26 = vor.u32 %v384_v20, %v304_v21  ;;  %v315_v27 = vor.u32 %v386_v22, %v312_v23  ;;  %v431_v28 = vld [vmem:[%s578_s2] ss:$0 sm:$0xff] }
   0xa   :  { %172 = vmatpush.bf16.msra.mxu0 %v393_v4  ;;  %417 = vmatpush.bf16.msra.mxu2 %v393_v4 }
   0xb   :  { %191 = vmatpush.bf16.msra.mxu1 %v401_v5  ;;  %425 = vmatpush.bf16.msra.mxu3 %v401_v5 }
   0xe   :  { %173 = vmatpush.bf16.msra.mxu0 %v392_v6  ;;  %418 = vmatpush.bf16.msra.mxu2 %v392_v6 }
   0xf   :  { %192 = vmatpush.bf16.msra.mxu1 %v400_v7  ;;  %426 = vmatpush.bf16.msra.mxu3 %v400_v7 }
  0x12   :  { %174 = vmatpush.bf16.msra.mxu0 %v391_v8  ;;  %419 = vmatpush.bf16.msra.mxu2 %v391_v8 }
  0x13   :  { %193 = vmatpush.bf16.msra.mxu1 %v399_v9  ;;  %427 = vmatpush.bf16.msra.mxu3 %v399_v9 }
  0x16   :  { %175 = vmatpush.bf16.msra.mxu0 %v390_v10  ;;  %420 = vmatpush.bf16.msra.mxu2 %v390_v10 }
  0x17   :  { %194 = vmatpush.bf16.msra.mxu1 %v398_v11  ;;  %428 = vmatpush.bf16.msra.mxu3 %v398_v11 }
  0x1a   :  { %176 = vmatpush.bf16.msra.mxu0 %v389_v12  ;;  %421 = vmatpush.bf16.msra.mxu2 %v389_v12 }
  0x1b   :  { %195 = vmatpush.bf16.msra.mxu1 %v397_v13  ;;  %429 = vmatpush.bf16.msra.mxu3 %v397_v13 }
  0x1e   :  { %177 = vmatpush.bf16.msra.mxu0 %v388_v14  ;;  %422 = vmatpush.bf16.msra.mxu2 %v388_v14 }
  0x1f   :  { %196 = vmatpush.bf16.msra.mxu1 %v396_v15  ;;  %430 = vmatpush.bf16.msra.mxu3 %v396_v15 }
  0x21   :  { %178 = vmatmul.bf16.vlgmr.msra.gmra.mxu0 %v303_v24  ;;  %183 = vmatmul.bf16.vlgmr.msra.gmra.mxu2 %v311_v25 }
  0x22   :  { %197 = vmatmul.bf16.vlgmr.msra.gmra.mxu1 %v307_v26  ;;  %202 = vmatmul.bf16.vlgmr.msra.gmra.mxu3 %v315_v27 }
  0x9e   :  { %v179_v29 = vpop.f32.mrf.mxu0 }
  0x9f   :  { %v180_v30 = vadd.f32 %v431_v28, %v179_v29  ;;  %v198_v31 = vpop.f32.mrf.mxu1 }
  0xa1   :  { %v543_v32 = vadd.f32 %v198_v31, %v180_v30 }
  0xa3   :  { %v380_v33 = vmul.f32 -1.442695, %v543_v32 }
  0xa4   :  { %v184_v34 = vpop.f32.mrf.mxu2 }
  0xa5   :  { %432 = vpow2.f32 %v380_v33  ;;  %v185_v35 = vadd.f32 %v431_v28, %v184_v34  ;;  %v203_v36 = vpop.f32.mrf.mxu3 }
  0xa6   :  { %v181_v37 = vpop.f32.mrf.mxu0 }
  0xa7   :  { %v546_v38 = vadd.f32 %v203_v36, %v185_v35  ;;  %v182_v39 = vadd.f32 %v431_v28, %v181_v37  ;;  %v200_v40 = vpop.f32.mrf.mxu1 }
  0xa9   :  { %v382_v41 = vmul.f32 -1.442695, %v546_v38  ;;  %v549_v42 = vadd.f32 %v200_v40, %v182_v39 }
  0xab   :  { %v433_v43 = vpop.eup %432  ;;  %434 = vpow2.f32 %v382_v41  ;;  %v381_v44 = vmul.f32 -1.442695, %v549_v42 }
  0xac   :  { %v220_v45 = vadd.f32 1.0, %v433_v43  ;;  %v186_v46 = vpop.f32.mrf.mxu2 }
  0xad   :  { %436 = vpow2.f32 %v381_v44  ;;  %v187_v47 = vadd.f32 %v431_v28, %v186_v46  ;;  %v205_v48 = vpop.f32.mrf.mxu3 }
  0xae   :  { %438 = vrcp.f32 %v220_v45  ;;  %v233_v0 = vand.u32 2147483647, %v220_v45  ;;  %vm229_vm0 = vweird.f32 %v220_v45  ;;  %v235_v4 = vand.u32 2147483648, %v220_v45 }
  0xaf   :  { %v552_v49 = vadd.f32 %v205_v48, %v187_v47 }
  0xb0   :  { %vm234_vm3 = vcmp.eq.f32.partialorder %v233_v0, 8.507059e+37  ;;  %v236_v13 = vor.u32 1.1754944e-38, %v235_v4 }
  0xb1   :  { %v435_v50 = vpop.eup %434  ;;  %v383_v51 = vmul.f32 -1.442695, %v552_v49 }
  0xb2   :  { %v222_v52 = vadd.f32 1.0, %v435_v50 }
  0xb3   :  { %v437_v53 = vpop.eup %436  ;;  %440 = vpow2.f32 %v383_v51 }
  0xb4   :  { %v439_v54 = vpop.eup %438  ;;  %442 = vrcp.f32 %v222_v52  ;;  %v221_v56 = vadd.f32 1.0, %v437_v53  ;;  %vm259_vm6 = vweird.f32 %v222_v52  ;;  %v265_v16 = vand.u32 2147483648, %v222_v52 }
  0xb5   :  { %v225_v55 = vmul.f32 %v439_v54, %v220_v45  ;;  %vm230_vm1 = vweird.f32 %v439_v54  ;;  %v263_v19 = vand.u32 2147483647, %v222_v52 }
  0xb6   :  { %444 = vrcp.f32 %v221_v56  ;;  %vm555_vm2 = vmor %vm229_vm0, %vm230_vm1  ;;  %v250_v8 = vand.u32 2147483648, %v221_v56  ;;  %v248_v12 = vand.u32 2147483647, %v221_v56  ;;  %vm244_vm7 = vweird.f32 %v221_v56 }
  0xb7   :  { %v226_v57 = vsub.f32 1.0, %v225_v55  ;;  %v266_v30 = vor.u32 1.1754944e-38, %v265_v16  ;;  %vm264_vm12 = vcmp.eq.f32.partialorder %v263_v19, 8.507059e+37 }
  0xb8   :  { %v251_v20 = vor.u32 1.1754944e-38, %v250_v8  ;;  %vm249_vm10 = vcmp.eq.f32.partialorder %v248_v12, 8.507059e+37 }
  0xb9   :  { %v441_v58 = vpop.eup %440  ;;  %v227_v60 = vmul.f32 %v439_v54, %v226_v57 }
  0xba   :  { %v443_v59 = vpop.eup %442  ;;  %v223_v61 = vadd.f32 1.0, %v441_v58 }
  0xbb   :  { %v255_v62 = vmul.f32 %v443_v59, %v222_v52  ;;  %v228_v2 = vadd.f32 %v439_v54, %v227_v60  ;;  %vm260_vm5 = vweird.f32 %v443_v59 }
  0xbc   :  { %446 = vrcp.f32 %v223_v61  ;;  %v445_v63 = vpop.eup %444  ;;  %vm561_vm9 = vmor %vm259_vm6, %vm260_vm5  ;;  %v278_v24 = vand.u32 2147483647, %v223_v61  ;;  %v280_v25 = vand.u32 2147483648, %v223_v61  ;;  %vm274_vm13 = vweird.f32 %v223_v61 }
  0xbd   :  { %v256_v1 = vsub.f32 1.0, %v255_v62  ;;  %v240_v3 = vmul.f32 %v445_v63, %v221_v56  ;;  %v232_v10 = vsel %vm555_vm2, %v439_v54, %v228_v2  ;;  %vm245_vm4 = vweird.f32 %v445_v63 }
  0xbe   :  { %v237_v18 = vsel %vm234_vm3, %v236_v13, %v232_v10  ;;  %vm246_vm8 = vmor %vm244_vm7, %vm245_vm4  ;;  %v281_v36 = vor.u32 1.1754944e-38, %v280_v25  ;;  %vm279_vm15 = vcmp.eq.f32.partialorder %v278_v24, 8.507059e+37 }
  0xbf   :  { %v257_v5 = vmul.f32 %v443_v59, %v256_v1  ;;  %v241_v6 = vsub.f32 1.0, %v240_v3  ;;  %v284_v29 = vmul.f32 %v237_v18, %v543_v32 }
  0xc1   :  { %v242_v11 = vmul.f32 %v445_v63, %v241_v6  ;;  %v258_v14 = vadd.f32 %v443_v59, %v257_v5 }
  0xc2   :  { %v447_v9 = vpop.eup %446 }
  0xc3   :  { %v270_v15 = vmul.f32 %v447_v9, %v223_v61  ;;  %v243_v17 = vadd.f32 %v445_v63, %v242_v11  ;;  %v262_v26 = vsel %vm561_vm9, %v443_v59, %v258_v14  ;;  %vm275_vm11 = vweird.f32 %v447_v9 }
  0xc4   :  { %v267_v34 = vsel %vm264_vm12, %v266_v30, %v262_v26  ;;  %vm276_vm14 = vmor %vm274_vm13, %vm275_vm11 }
  0xc5   :  { %v271_v21 = vsub.f32 1.0, %v270_v15  ;;  %v247_v23 = vsel %vm246_vm8, %v445_v63, %v243_v17  ;;  %v286_v40 = vmul.f32 %v267_v34, %v546_v38 }
  0xc6   :  { %v252_v27 = vsel %vm249_vm10, %v251_v20, %v247_v23 }
  0xc7   :  { %v272_v28 = vmul.f32 %v447_v9, %v271_v21  ;;  %v285_v31 = vmul.f32 %v252_v27, %v549_v42 }
  0xc9   :  { %v273_v33 = vadd.f32 %v447_v9, %v272_v28  ;;  %v407_v35 = vpack.c.bf16 %v285_v31, %v284_v29 }
  0xcb   :  { %v277_v37 = vsel %vm276_vm14, %v447_v9, %v273_v33  ;;  %408 = vst [vmem:[%s580_s3] sm:$0xff] %v407_v35  }
  0xcc   :  { %v282_v39 = vsel %vm279_vm15, %v281_v36, %v277_v37 }
  0xcd   :  { %v287_v32 = vmul.f32 %v282_v39, %v552_v49 }
  0xcf   :  { %v412_v41 = vpack.c.bf16 %v287_v32, %v286_v40 }
  0xd1   :  { %414 = vst [vmem:[%s580_s3 + $0x8] sm:$0xff] %v412_v41  }

</bundles_post_ra>
